<compile_context>
chip_gen: v7x
topology: tpu7x:2x2x1
jax: 0.10.0
libtpu: 0.0.40
codegen_flags: <defaults>
</compile_context>

<pallas_src>
import functools

import jax
import jax.numpy as jnp
from jax.experimental import pallas as pl
from jax.experimental.pallas import tpu as pltpu

BATCH_NORM_EPSILON = 1e-5


# ---------------------------------------------------------------------------
# Per-generation VMEM budgeting
# ---------------------------------------------------------------------------
def _vmem_capacity_bytes():
    try:
        return int(pltpu.get_tpu_info().vmem_capacity_bytes)
    except Exception:
        return 64 << 20  # v7x per-core physical VMEM (smallest of the listed gens)


_VMEM_CAPACITY = _vmem_capacity_bytes()
_VMEM_BUDGET = (_VMEM_CAPACITY * 6) // 10          # leave headroom for Mosaic scratch


def _vmem_limit(need_bytes):
    """Explicit scoped-VMEM limit: 2x slack over our estimate, capped to the HW."""
    return int(min(max(2 * need_bytes, 8 << 20), (_VMEM_CAPACITY * 17) // 20))


# ---------------------------------------------------------------------------
# Kernels
# ---------------------------------------------------------------------------
def _proj_flat_kernel(x_ref, w_ref, shift_ref, o_ref):
    # x_ref:(Cin, ts)  w_ref:(Cout, Cin)  shift_ref:(Cout, 1)  o_ref:(Cout, ts)
    y = jnp.dot(w_ref[...], x_ref[...], preferred_element_type=jnp.float32)
    o_ref[...] = (y + shift_ref[...]).astype(o_ref.dtype)


def _proj_strided_kernel(x_ref, w_ref, shift_ref, o_ref, *, stride):
    # x_ref:(nb, Cin, H, W) un-subsampled images; o_ref:(nb, Cout, (H//s)*(W//s))
    nb, cin, hi, wi = x_ref.shape
    hp, wp = hi // stride, wi // stride
    w = w_ref[...]
    shift = shift_ref[...]
    for b in range(nb):                                   # static unroll
        x = x_ref[b]                                      # (Cin, H, W)
        # 1x1 conv with stride == take the top-left pixel of every s x s block.
        x = x.reshape(cin, hp, stride, wi)[:, :, 0, :]    # H-stride select
        x = x.reshape(cin, hp, wp, stride)[:, :, :, 0]    # W-stride select
        x = x.reshape(cin, hp * wp).astype(w.dtype)       # lane-dense RHS (+cast)
        y = jnp.dot(w, x, preferred_element_type=jnp.float32)
        o_ref[b] = (y + shift).astype(o_ref.dtype)


# ---------------------------------------------------------------------------
# pallas_call builders
# ---------------------------------------------------------------------------
def _invariant_spec(shape, index_map, single_buffer):
    # Grid-invariant operand: fetched once; single-buffer it to save VMEM.
    if single_buffer:
        return pl.BlockSpec(shape, index_map, pipeline_mode=pl.Buffered(1))
    return pl.BlockSpec(shape, index_map)


def _cost(n, cin, cout, msp, x_bytes, w_bytes, out_bytes):
    return pl.CostEstimate(flops=int(2 * n * msp * cin * cout),
                           transcendentals=0,
                           bytes_accessed=int(x_bytes + w_bytes + out_bytes))


def _flat_call(x_flat, wmat, shift, out_dtype, *, spatial_tile, tuned):
    """Matmul over the pre-flattened (N, Cin, H'*W') activations."""
    n, cin, msp = x_flat.shape
    cout = wmat.shape[0]
    ei = x_flat.dtype.itemsize
    eo = jnp.dtype(out_dtype).itemsize

    # Spatial tile on the lane axis: multiple of 128, as large as the VMEM budget
    # allows (bigger tiles amortise the ~0.35us/step overhead; v6e has the most
    # headroom, v7x the least - the budget above is derived from the actual HW).
    ts = max(128, (int(spatial_tile) // 128) * 128)
    ts = min(ts, pl.cdiv(msp, 128) * 128)

    def vmem_need(t):
        return (2 * cin * t * ei + 2 * cout * t * eo          # double-buffered tiles
                + (1 if tuned else 2) * cout * cin * wmat.dtype.itemsize
                + 2 * cout * 128 * 4)                         # shift

    while ts > 128 and vmem_need(ts) > _VMEM_BUDGET:
        ts -= 128

    grid = (n, pl.cdiv(msp, ts))
    cp_kwargs = dict(dimension_semantics=("parallel", "parallel"))
    extra = {}
    if tuned:
        cp_kwargs["vmem_limit_bytes"] = _vmem_limit(vmem_need(ts))
        extra["cost_estimate"] = _cost(n, cin, cout, msp,
                                       x_flat.size * ei,
                                       wmat.size * wmat.dtype.itemsize,
                                       n * cout * msp * eo)

    out = pl.pallas_call(
        _proj_flat_kernel,
        out_shape=jax.ShapeDtypeStruct((n, cout, msp), out_dtype),
        grid_spec=pltpu.PrefetchScalarGridSpec(
            num_scalar_prefetch=0,
            grid=grid,
            in_specs=[
                pl.BlockSpec((None, cin, ts), lambda b, j: (b, 0, j)),
                _invariant_spec((cout, cin), lambda b, j: (0, 0), tuned),
                _invariant_spec((cout, 1), lambda b, j: (0, 0), tuned),
            ],
            out_specs=pl.BlockSpec((None, cout, ts), lambda b, j: (b, 0, j)),
        ),
        compiler_params=pltpu.CompilerParams(**cp_kwargs),
        **extra,
    )(x_flat, wmat, shift)
    return out


def _strided_call(x_nchw, wmat, shift, out_dtype, *, stride, spatial_tile):
    """Fused plan: no materialised subsample; stride handled inside the kernel."""
    n, cin, hi, wi = x_nchw.shape
    cout = wmat.shape[0]
    hp, wp = hi // stride, wi // stride
    msp = hp * wp
    ei = x_nchw.dtype.itemsize
    eo = jnp.dtype(out_dtype).itemsize
    msp_pad = pl.cdiv(msp, 128) * 128

    # Images per grid step: fill ~spatial_tile lanes, fit the VMEM budget, keep
    # >= 2 grid steps (v7x has two TensorCores), and divide the batch exactly.
    nb = max(1, min(n, int(spatial_tile) // msp_pad))

    def vmem_need(k):
        return (2 * k * cin * hi * wi * ei      # double-buffered input blocks
                + 4 * k * cin * hi * wi * ei    # stride-select temporaries (upper bound)
                + 2 * k * cout * msp_pad * eo   # double-buffered output blocks
                + cout * cin * wmat.dtype.itemsize + cout * 128 * 4)

    while nb > 1 and vmem_need(nb) > _VMEM_BUDGET:
        nb -= 1
    if vmem_need(nb) > _VMEM_BUDGET:
        raise ValueError("strided plan does not fit the VMEM budget")
    if n >= 2:
        nb = min(nb, max(1, n // 2))
    while n % nb:
        nb -= 1

    out = pl.pallas_call(
        functools.partial(_proj_strided_kernel, stride=stride),
        out_shape=jax.ShapeDtypeStruct((n, cout, msp), out_dtype),
        grid_spec=pltpu.PrefetchScalarGridSpec(
            num_scalar_prefetch=0,
            grid=(n // nb,),
            in_specs=[
                pl.BlockSpec((nb, cin, hi, wi), lambda b: (b, 0, 0, 0)),
                _invariant_spec((cout, cin), lambda b: (0, 0), True),
                _invariant_spec((cout, 1), lambda b: (0, 0), True),
            ],
            out_specs=pl.BlockSpec((nb, cout, msp), lambda b: (b, 0, 0)),
        ),
        compiler_params=pltpu.CompilerParams(
            dimension_semantics=("parallel",),
            vmem_limit_bytes=_vmem_limit(vmem_need(nb)),
        ),
        cost_estimate=_cost(n, cin, cout, msp,
                            x_nchw.size * ei, wmat.size * wmat.dtype.itemsize,
                            n * cout * msp * eo),
    )(x_nchw, wmat, shift)
    return out.reshape(n, cout, hp, wp)


# ---------------------------------------------------------------------------
# Plan application / one-time (cached) plan validation
# ---------------------------------------------------------------------------
def _fold_bn(conv_w, gamma, beta, run_mean, run_var):
    cout, cin = conv_w.shape[0], conv_w.shape[1]
    scale = gamma / jnp.sqrt(run_var + BATCH_NORM_EPSILON)            # (Cout,)
    wmat = (conv_w.reshape(cout, cin) * scale[:, None]).astype(jnp.float32)
    shift = (beta - run_mean * scale).reshape(cout, 1).astype(jnp.float32)
    return wmat, shift


def _apply_plan(plan, x, wmat, shift, out_dtype, *, stride, spatial_tile,
                compute_dtype):
    n, cin = x.shape[0], x.shape[1]
    cout = wmat.shape[0]
    wm = wmat.astype(compute_dtype)
    if plan == "strided":
        # The kernel reads the original NCHW tensor and does the stride selection
        # (and the compute-dtype cast, on the selected quarter only) in VMEM.
        return _strided_call(x, wm, shift, out_dtype, stride=stride,
                             spatial_tile=spatial_tile)
    # Fallback plans: materialise the subsample (free for stride == 1); the
    # slice + cast fuse into a single XLA pass under jit.
    if stride > 1:
        x = x[:, :, ::stride, ::stride]
    hp, wp = x.shape[2], x.shape[3]
    x_flat = x.astype(compute_dtype).reshape(n, cin, hp * wp)
    out = _flat_call(x_flat, wm, shift, out_dtype, spatial_tile=spatial_tile,
                     tuned=(plan == "flat_tuned"))
    return out.reshape(n, cout, hp, wp)


@functools.lru_cache(maxsize=None)
def _choose_plan(n, cin, cout, hi, wi, stride, in_dtype, compute_dtype,
                 out_dtype, spatial_tile):
    """Pick the best plan that lowers *and* validates on this toolchain (cached)."""
    in_dt, cdt, odt = (jnp.dtype(in_dtype), jnp.dtype(compute_dtype),
                       jnp.dtype(out_dtype))
    candidates = []
    if stride > 1 and hi % stride == 0 and wi % stride == 0:
        candidates.append("strided")
    candidates += ["flat_tuned", "flat"]          # "flat" == known-good baseline

    kx, kw = jax.random.split(jax.random.PRNGKey(1234))
    x = jax.random.normal(kx, (n, cin, hi, wi), dtype=jnp.float32)
    wm = 0.1 * jax.random.normal(kw, (cout, cin), dtype=jnp.float32)
    shift = jnp.linspace(-0.5, 0.5, cout, dtype=jnp.float32).reshape(cout, 1)
    xs = x[:, :, ::stride, ::stride] if stride > 1 else x
    ref = jnp.einsum("nchw,oc->nohw", xs, wm) + shift.reshape(1, cout, 1, 1)

    for plan in candidates:
        if plan == "flat":
            return plan                            # last resort, always accepted
        try:
            y = _apply_plan(plan, x.astype(in_dt), wm, shift, odt,
                            stride=stride, spatial_tile=spatial_tile,
                            compute_dtype=cdt)
            y = jax.block_until_ready(y).astype(jnp.float32)
            rel = float(jnp.max(jnp.abs(y - ref)) /
                        (jnp.max(jnp.abs(ref)) + 1e-6))
            if rel == rel and rel < 5e-2:          # finite and close
                return plan
        except Exception:
            pass
    return "flat"


# ---------------------------------------------------------------------------
# Public entry point
# ---------------------------------------------------------------------------
def projection_forward(x_nchw, conv_w, gamma, beta, run_mean, run_var, *,
                       stride, compute_dtype=jnp.bfloat16, out_dtype=None,
                       spatial_tile=1024):
    """Forward of SimCLRv2 `Projection` (sk_ratio == 0, eval-mode BatchNorm).

    x_nchw: (N, Cin, H, W); conv_w: (Cout, Cin, 1, 1).  Returns NCHW output.
    compute_dtype defaults to bfloat16 (f32 MXU accumulate); pass jnp.float32
    for bit-tight results, or out_dtype=jnp.bfloat16 when the consumer
    tolerates a bf16 output (halves output write bytes).
    """
    n, cin, hi, wi = x_nchw.shape
    cout = conv_w.shape[0]
    if compute_dtype is None:
        compute_dtype = x_nchw.dtype
    if out_dtype is None:
        out_dtype = x_nchw.dtype
    wmat, shift = _fold_bn(conv_w, gamma, beta, run_mean, run_var)
    plan = _choose_plan(n, cin, cout, hi, wi, int(stride),
                        jnp.dtype(x_nchw.dtype).name,
                        jnp.dtype(compute_dtype).name,
                        jnp.dtype(out_dtype).name, int(spatial_tile))
    return _apply_plan(plan, x_nchw, wmat, shift, jnp.dtype(out_dtype),
                       stride=int(stride), spatial_tile=int(spatial_tile),
                       compute_dtype=jnp.dtype(compute_dtype))


if __name__ == "__main__":
    # Module config: Projection(in_channels=4, out_channels=8, stride=2, sk_ratio=0)
    in_channels, out_channels, stride = 4, 8, 2
    N, H, W = 2, 16, 16

    key = jax.random.PRNGKey(0)
    k_x, k_w, k_g, k_b, k_m, k_v = jax.random.split(key, 6)
    x = jax.random.normal(k_x, (N, in_channels, H, W), dtype=jnp.float32)
    conv_w = 0.1 * jax.random.normal(k_w, (out_channels, in_channels, 1, 1),
                                     dtype=jnp.float32)
    gamma = 1.0 + 0.1 * jax.random.normal(k_g, (out_channels,), dtype=jnp.float32)
    beta = 0.1 * jax.random.normal(k_b, (out_channels,), dtype=jnp.float32)
    run_mean = 0.1 * jax.random.normal(k_m, (out_channels,), dtype=jnp.float32)
    run_var = 1.0 + 0.1 * jax.random.uniform(k_v, (out_channels,),
                                             dtype=jnp.float32)

    def reference(inp, s):
        xs = inp[:, :, ::s, ::s]
        r = jnp.einsum("nchw,oc->nohw", xs,
                       conv_w.reshape(out_channels, in_channels))
        r = (r - run_mean[None, :, None, None]) / jnp.sqrt(
            run_var[None, :, None, None] + BATCH_NORM_EPSILON)
        return r * gamma[None, :, None, None] + beta[None, :, None, None]

    # Default path: bf16 compute (f32 accumulate), f32 output.
    y = jax.block_until_ready(
        projection_forward(x, conv_w, gamma, beta, run_mean, run_var,
                           stride=stride))
    ref = reference(x, stride)
    assert y.shape == (N, out_channels, H // stride, W // stride)
    assert y.dtype == x.dtype
    assert float(jnp.max(jnp.abs(y - ref))) < 3e-2   # bf16-compute tolerance

    # f32 compute path: bit-tight against the reference.
    y32 = jax.block_until_ready(
        projection_forward(x, conv_w, gamma, beta, run_mean, run_var,
                           stride=stride, compute_dtype=jnp.float32))
    assert jnp.allclose(y32, ref, atol=1e-5, rtol=1e-5)

    # stride == 1 path (no subsample anywhere).
    y1 = jax.block_until_ready(
        projection_forward(x, conv_w, gamma, beta, run_mean, run_var,
                           stride=1, compute_dtype=jnp.float32))
    assert jnp.allclose(y1, reference(x, 1), atol=1e-5, rtol=1e-5)

    print("KERNEL_OK")
</pallas_src>

<mosaic_0001>
module attributes {stable_mosaic.version = 11 : i64} {
  func.func @_proj_strided_kernel(%arg0: i32, %arg1: memref<1x4x16x16xf32, #tpu.memory_space<vmem>>, %arg2: memref<8x4xbf16, #tpu.memory_space<vmem>>, %arg3: memref<8x1xf32, #tpu.memory_space<vmem>>, %arg4: memref<1x8x64xf32, #tpu.memory_space<vmem>>) attributes {dimension_semantics = [#tpu.dimension_semantics<parallel>], iteration_bounds = array<i64: 2>, scalar_prefetch = 0 : i64, scratch_operands = 0 : i64, tpu.core_type = #tpu.core_type<tc>, window_params = [{transform_indices = @transform_0, window_bounds = array<i64: 1, 4, 16, 16>}, {pipeline_mode = #tpu.pipeline_mode<synchronous>, transform_indices = @transform_1, window_bounds = array<i64: 8, 4>}, {pipeline_mode = #tpu.pipeline_mode<synchronous>, transform_indices = @transform_2, window_bounds = array<i64: 8, 1>}, {transform_indices = @transform_3, window_bounds = array<i64: 1, 8, 64>}]} {
    %c0 = arith.constant 0 : index
    %c0_0 = arith.constant 0 : index
    %0 = vector.load %arg2[%c0, %c0_0] : memref<8x4xbf16, #tpu.memory_space<vmem>>, vector<8x4xbf16>
    %c0_1 = arith.constant 0 : index
    %c0_2 = arith.constant 0 : index
    %1 = vector.load %arg3[%c0_1, %c0_2] : memref<8x1xf32, #tpu.memory_space<vmem>>, vector<8x1xf32>
    %c0_3 = arith.constant 0 : index
    %c0_4 = arith.constant 0 : index
    %c0_5 = arith.constant 0 : index
    %c0_6 = arith.constant 0 : index
    %2 = vector.load %arg1[%c0_3, %c0_4, %c0_5, %c0_6] : memref<1x4x16x16xf32, #tpu.memory_space<vmem>>, vector<1x4x16x16xf32>
    %3 = vector.shape_cast %2 : vector<1x4x16x16xf32> to vector<4x16x16xf32>
    %4 = vector.shape_cast %3 : vector<4x16x16xf32> to vector<4x8x2x16xf32>
    %5 = vector.extract_strided_slice %4 {offsets = [0, 0, 0, 0], sizes = [4, 8, 1, 16], strides = [1, 1, 1, 1]} : vector<4x8x2x16xf32> to vector<4x8x1x16xf32>
    %6 = vector.shape_cast %5 : vector<4x8x1x16xf32> to vector<4x8x16xf32>
    %7 = vector.shape_cast %6 : vector<4x8x16xf32> to vector<4x8x8x2xf32>
    %8 = vector.extract_strided_slice %7 {offsets = [0, 0, 0, 0], sizes = [4, 8, 8, 1], strides = [1, 1, 1, 1]} : vector<4x8x8x2xf32> to vector<4x8x8x1xf32>
    %9 = vector.shape_cast %8 : vector<4x8x8x1xf32> to vector<4x8x8xf32>
    %10 = vector.shape_cast %9 : vector<4x8x8xf32> to vector<4x64xf32>
    %11 = arith.truncf %10 : vector<4x64xf32> to vector<4x64xbf16>
    %cst = arith.constant dense<0.000000e+00> : vector<8x64xf32>
    %12 = tpu.matmul %0, %11, %cst {dimension_numbers = #tpu.dot_dimension_numbers<[1], [0], [0], [1], [0, 0, 1, 1], [], []>} : vector<8x4xbf16>, vector<4x64xbf16>, vector<8x64xf32> -> vector<8x64xf32>
    %13 = vector.broadcast %1 : vector<8x1xf32> to vector<8x64xf32>
    %14 = arith.addf %12, %13 : vector<8x64xf32>
    %c0_7 = arith.constant 0 : index
    %c0_8 = arith.constant 0 : index
    %c0_9 = arith.constant 0 : index
    %15 = vector.load %arg4[%c0_7, %c0_8, %c0_9] : memref<1x8x64xf32, #tpu.memory_space<vmem>>, vector<1x8x64xf32>
    %16 = vector.shape_cast %15 : vector<1x8x64xf32> to vector<8x64xf32>
    %17 = vector.shape_cast %14 : vector<8x64xf32> to vector<1x8x64xf32>
    tpu.vector_store %arg4[%c0_7, %c0_8, %c0_9], %17 {strides = array<i32>} : memref<1x8x64xf32, #tpu.memory_space<vmem>>, vector<1x8x64xf32>,
    return
  }
  func.func @transform_0(%arg0: i32) -> (i32, i32, i32, i32) {
    %c0_i32 = arith.constant 0 : i32
    %c0_i32_0 = arith.constant 0 : i32
    %c0_i32_1 = arith.constant 0 : i32
    %c0_i32_2 = arith.constant 0 : i32
    return %arg0, %c0_i32, %c0_i32_0, %c0_i32_1 : i32, i32, i32, i32
  }
  func.func @transform_1(%arg0: i32) -> (i32, i32) {
    %c0_i32 = arith.constant 0 : i32
    %c0_i32_0 = arith.constant 0 : i32
    %c0_i32_1 = arith.constant 0 : i32
    return %c0_i32, %c0_i32_0 : i32, i32
  }
  func.func @transform_2(%arg0: i32) -> (i32, i32) {
    %c0_i32 = arith.constant 0 : i32
    %c0_i32_0 = arith.constant 0 : i32
    %c0_i32_1 = arith.constant 0 : i32
    return %c0_i32, %c0_i32_0 : i32, i32
  }
  func.func @transform_3(%arg0: i32) -> (i32, i32, i32) {
    %c0_i32 = arith.constant 0 : i32
    %c0_i32_0 = arith.constant 0 : i32
    %c0_i32_1 = arith.constant 0 : i32
    return %arg0, %c0_i32, %c0_i32_0 : i32, i32, i32
  }
}

module attributes {stable_mosaic.version = 11 : i64} {
  func.func @_proj_flat_kernel(%arg0: i32, %arg1: i32, %arg2: memref<1x4x128xbf16, #tpu.memory_space<vmem>>, %arg3: memref<8x4xbf16, #tpu.memory_space<vmem>>, %arg4: memref<8x1xf32, #tpu.memory_space<vmem>>, %arg5: memref<1x8x128xf32, #tpu.memory_space<vmem>>) attributes {dimension_semantics = [#tpu.dimension_semantics<parallel>, #tpu.dimension_semantics<parallel>], iteration_bounds = array<i64: 2, 1>, scalar_prefetch = 0 : i64, scratch_operands = 0 : i64, tpu.core_type = #tpu.core_type<tc>, window_params = [{transform_indices = @transform_0, window_bounds = array<i64: 1, 4, 128>}, {pipeline_mode = #tpu.pipeline_mode<synchronous>, transform_indices = @transform_1, window_bounds = array<i64: 8, 4>}, {pipeline_mode = #tpu.pipeline_mode<synchronous>, transform_indices = @transform_2, window_bounds = array<i64: 8, 1>}, {transform_indices = @transform_3, window_bounds = array<i64: 1, 8, 128>}]} {
    %c0 = arith.constant 0 : index
    %c0_0 = arith.constant 0 : index
    %0 = vector.load %arg3[%c0, %c0_0] : memref<8x4xbf16, #tpu.memory_space<vmem>>, vector<8x4xbf16>
    %c0_1 = arith.constant 0 : index
    %c0_2 = arith.constant 0 : index
    %c0_3 = arith.constant 0 : index
    %1 = vector.load %arg2[%c0_1, %c0_2, %c0_3] : memref<1x4x128xbf16, #tpu.memory_space<vmem>>, vector<1x4x128xbf16>
    %2 = vector.shape_cast %1 : vector<1x4x128xbf16> to vector<4x128xbf16>
    %cst = arith.constant dense<0.000000e+00> : vector<8x128xf32>
    %3 = tpu.matmul %0, %2, %cst {dimension_numbers = #tpu.dot_dimension_numbers<[1], [0], [0], [1], [0, 0, 1, 1], [], []>} : vector<8x4xbf16>, vector<4x128xbf16>, vector<8x128xf32> -> vector<8x128xf32>
    %c0_4 = arith.constant 0 : index
    %c0_5 = arith.constant 0 : index
    %4 = vector.load %arg4[%c0_4, %c0_5] : memref<8x1xf32, #tpu.memory_space<vmem>>, vector<8x1xf32>
    %5 = vector.broadcast %4 : vector<8x1xf32> to vector<8x128xf32>
    %6 = arith.addf %3, %5 : vector<8x128xf32>
    %c0_6 = arith.constant 0 : index
    %c0_7 = arith.constant 0 : index
    %c0_8 = arith.constant 0 : index
    %7 = vector.load %arg5[%c0_6, %c0_7, %c0_8] : memref<1x8x128xf32, #tpu.memory_space<vmem>>, vector<1x8x128xf32>
    %8 = vector.shape_cast %7 : vector<1x8x128xf32> to vector<8x128xf32>
    %9 = vector.shape_cast %6 : vector<8x128xf32> to vector<1x8x128xf32>
    tpu.vector_store %arg5[%c0_6, %c0_7, %c0_8], %9 {strides = array<i32>} : memref<1x8x128xf32, #tpu.memory_space<vmem>>, vector<1x8x128xf32>,
    return
  }
  func.func @transform_0(%arg0: i32, %arg1: i32) -> (i32, i32, i32) {
    %c0_i32 = arith.constant 0 : i32
    %c0_i32_0 = arith.constant 0 : i32
    return %arg0, %c0_i32, %arg1 : i32, i32, i32
  }
  func.func @transform_1(%arg0: i32, %arg1: i32) -> (i32, i32) {
    %c0_i32 = arith.constant 0 : i32
    %c0_i32_0 = arith.constant 0 : i32
    %c0_i32_1 = arith.constant 0 : i32
    return %c0_i32, %c0_i32_0 : i32, i32
  }
  func.func @transform_2(%arg0: i32, %arg1: i32) -> (i32, i32) {
    %c0_i32 = arith.constant 0 : i32
    %c0_i32_0 = arith.constant 0 : i32
    %c0_i32_1 = arith.constant 0 : i32
    return %c0_i32, %c0_i32_0 : i32, i32
  }
  func.func @transform_3(%arg0: i32, %arg1: i32) -> (i32, i32, i32) {
    %c0_i32 = arith.constant 0 : i32
    %c0_i32_0 = arith.constant 0 : i32
    return %arg0, %c0_i32, %arg1 : i32, i32, i32
  }
}

module attributes {stable_mosaic.version = 11 : i64} {
  func.func @_proj_flat_kernel(%arg0: i32, %arg1: i32, %arg2: memref<1x4x128xbf16, #tpu.memory_space<vmem>>, %arg3: memref<8x4xbf16, #tpu.memory_space<vmem>>, %arg4: memref<8x1xf32, #tpu.memory_space<vmem>>, %arg5: memref<1x8x128xf32, #tpu.memory_space<vmem>>) attributes {dimension_semantics = [#tpu.dimension_semantics<parallel>, #tpu.dimension_semantics<parallel>], iteration_bounds = array<i64: 2, 1>, scalar_prefetch = 0 : i64, scratch_operands = 0 : i64, tpu.core_type = #tpu.core_type<tc>, window_params = [{transform_indices = @transform_0, window_bounds = array<i64: 1, 4, 128>}, {pipeline_mode = #tpu.pipeline_mode<synchronous>, transform_indices = @transform_1, window_bounds = array<i64: 8, 4>}, {pipeline_mode = #tpu.pipeline_mode<synchronous>, transform_indices = @transform_2, window_bounds = array<i64: 8, 1>}, {transform_indices = @transform_3, window_bounds = array<i64: 1, 8, 128>}]} {
    %c0 = arith.constant 0 : index
    %c0_0 = arith.constant 0 : index
    %0 = vector.load %arg3[%c0, %c0_0] : memref<8x4xbf16, #tpu.memory_space<vmem>>, vector<8x4xbf16>
    %c0_1 = arith.constant 0 : index
    %c0_2 = arith.constant 0 : index
    %c0_3 = arith.constant 0 : index
    %1 = vector.load %arg2[%c0_1, %c0_2, %c0_3] : memref<1x4x128xbf16, #tpu.memory_space<vmem>>, vector<1x4x128xbf16>
    %2 = vector.shape_cast %1 : vector<1x4x128xbf16> to vector<4x128xbf16>
    %cst = arith.constant dense<0.000000e+00> : vector<8x128xf32>
    %3 = tpu.matmul %0, %2, %cst {dimension_numbers = #tpu.dot_dimension_numbers<[1], [0], [0], [1], [0, 0, 1, 1], [], []>} : vector<8x4xbf16>, vector<4x128xbf16>, vector<8x128xf32> -> vector<8x128xf32>
    %c0_4 = arith.constant 0 : index
    %c0_5 = arith.constant 0 : index
    %4 = vector.load %arg4[%c0_4, %c0_5] : memref<8x1xf32, #tpu.memory_space<vmem>>, vector<8x1xf32>
    %5 = vector.broadcast %4 : vector<8x1xf32> to vector<8x128xf32>
    %6 = arith.addf %3, %5 : vector<8x128xf32>
    %c0_6 = arith.constant 0 : index
    %c0_7 = arith.constant 0 : index
    %c0_8 = arith.constant 0 : index
    %7 = vector.load %arg5[%c0_6, %c0_7, %c0_8] : memref<1x8x128xf32, #tpu.memory_space<vmem>>, vector<1x8x128xf32>
    %8 = vector.shape_cast %7 : vector<1x8x128xf32> to vector<8x128xf32>
    %9 = vector.shape_cast %6 : vector<8x128xf32> to vector<1x8x128xf32>
    tpu.vector_store %arg5[%c0_6, %c0_7, %c0_8], %9 {strides = array<i32>} : memref<1x8x128xf32, #tpu.memory_space<vmem>>, vector<1x8x128xf32>,
    return
  }
  func.func @transform_0(%arg0: i32, %arg1: i32) -> (i32, i32, i32) {
    %c0_i32 = arith.constant 0 : i32
    %c0_i32_0 = arith.constant 0 : i32
    return %arg0, %c0_i32, %arg1 : i32, i32, i32
  }
  func.func @transform_1(%arg0: i32, %arg1: i32) -> (i32, i32) {
    %c0_i32 = arith.constant 0 : i32
    %c0_i32_0 = arith.constant 0 : i32
    %c0_i32_1 = arith.constant 0 : i32
    return %c0_i32, %c0_i32_0 : i32, i32
  }
  func.func @transform_2(%arg0: i32, %arg1: i32) -> (i32, i32) {
    %c0_i32 = arith.constant 0 : i32
    %c0_i32_0 = arith.constant 0 : i32
    %c0_i32_1 = arith.constant 0 : i32
    return %c0_i32, %c0_i32_0 : i32, i32
  }
  func.func @transform_3(%arg0: i32, %arg1: i32) -> (i32, i32, i32) {
    %c0_i32 = arith.constant 0 : i32
    %c0_i32_0 = arith.constant 0 : i32
    return %arg0, %c0_i32, %arg1 : i32, i32, i32
  }
}

</mosaic_0001>

<bundles_post_ra>
// kernel: tpu_custom_call.1
= control target key start
LH: loop header
LB: loop body
LE: loop exit
PB: predicated region body
PF: predicated region fallthrough
CT: control target
= control target key end

     0   :  { %8 = vsyncpa [#allocation3], 0  ;;  %s5273_s0 = inlined_call_operand.hbm [shape: f32[2,4,16,16], index: 0, kind: input, shape index: {}]   ;;  %s5274_s1 = inlined_call_operand.vmem [shape: bf16[8,4], index: 1, kind: input, shape index: {}]   ;;  %s5275_s2 = inlined_call_operand.vmem [shape: f32[8,1], index: 2, kind: input, shape index: {}]   ;;  %s5276_s3 = inlined_call_operand.hbm [shape: f32[2,8,64], index: 3, kind: output, shape index: {}]  }
   0x1   :  { %10 = vsyncpa [#allocation3 + $0x1], 0 }
   0x2   :  { %11 = vsyncpa [#allocation4], 0 }
   0x3   :  { %13 = vsyncpa [#allocation4 + $0x1], 0  ;;  %s3481_s12 = smov 0   ;;  %s3483_s13 = smov 0  }
   0x4   :  { %s3485_s14 = smov 0   ;;  %s3487_s15 = smov 0  }
   0x5 LB: > { %s3502_s16 = sadd.s32 4294967295, %s3443_s15   ;;  %s3254_s17 = sadd.s32 4294967294, %s3443_s15   ;;  %s3443_s15 = sphi %s3487_s15, %s5617_s15   ;;  %s3439_s14 = sphi %s3485_s14, %s5616_s14   ;;  %s3435_s13 = sphi %s3483_s13, %s5615_s13   ;;  %s3431_s12 = sphi %s3481_s12, %s5614_s12  }
   0x6   : > { %s3506_s18 = sadd.s32 1, %s3443_s15   ;;  %s26_s19 = sadd.s32 1, %s3439_s14 }
   0x7   : > { %s23_s20 = ssub.s32 %s3443_s15, %s3506_s18  ;;  %p33_p0 = scmp.ne.s32.totalorder %s3439_s14, %s3435_s13 }
   0x8   : > { %p24_p1 = scmp.eq.s32.totalorder %s23_s20, 0  ;;  %p34_p2 = scmp.eq.s32.totalorder %s3443_s15, 0 }
   0x9   : > { %p39_p3 = scmp.ne.s32.totalorder %s3435_s13, %s3431_s12  ;;  %p40_p4 = scmp.eq.s32.totalorder %s3502_s16, 0 }
   0xa   : > { %s3518_s21 = scalar_select %p24_p1, %s3439_s14, %s26_s19  }
   0xb   : > { %p3520_p5 = por %p34_p2, %p33_p0  ;;  %p3524_p6 = por %p40_p4, %p39_p3 }
   0xc   : > { %p105_p7 = scmp.eq.s32.totalorder %s3502_s16, 1  ;;  %p111_p8 = scmp.eq.s32.totalorder %s3254_s17, 1 }
   0xd   : > { %p3289_p10 = scmp.lt.s32.totalorder %s3443_s15, 2  ;;  %s137_s26 = sand.u32 1, %s3439_s14  }
   0xe   : > { %p3531_p11 = por %p105_p7, %p33_p0  ;;  %p3535_p12 = por %p111_p8, %p39_p3 }
   0xf   : > { %s3268_s27 = sshll.u32 %s3443_s15, 10  ;;  %s3257_s28 = sshll.u32 %s137_s26, 6 }
  0x10   : > { %s5314_s24 = scalar_select %p3531_p11, 1, 0 }
  0x11   : > { %s5315_s25 = scalar_select %p3535_p12, 1, 0 }
  0x12   : > { %s3544_s4 = scalar_lea.hbm %s5273_s0, %s3268_s27  ;;  %s141_s5 = scalar_lea.vmem [#allocation2], %s3257_s28 }
  0x13   : > { %s148_s6 = sshll.u32 %s141_s5, 4  ;;  %p3548_p13 = pnand %p3289_p10, %p3520_p5  ;;  %s3552_s6 = int_to_ptr.vmem [resolvable:$true] %s148_s6 }
  0x14   : > { %s3554_s8 = scalar_lea.sflag [#allocation3], %s137_s26  ;;  %s3347_s9 = scalar_lea.hbm %s3544_s4, 1024 }
  0x15   : > { %p3348_p0 = scmp.ne.s32.totalorder %s3544_s4, %s3347_s9  ;;  %p3349_p1 = pneg %p3548_p13 }
  0x16   : > { %s3352_s17 = scalar_lea.hbm %s5273_s0, 2048  ;;  %p3353_p4 = scmp.lt.u32.totalorder %s3544_s4, %s5273_s0 }
  0x17   : > { %p3350_p2 = pnand %p3349_p1, %p3348_p0  ;;  %p3354_p5 = scmp.lt.u32.totalorder %s3352_s17, %s3347_s9 }
  0x18   : > { %p3356_p8 = scmp.lt.u32.totalorder %s3347_s9, %s3544_s4 }
  0x19   : > { %p3351_p3 = pneg %p3350_p2  ;;  %p3355_p7 = por %p3354_p5, %p3353_p4 }
  0x1b   : > { %p3357_p10 = por %p3356_p8, %p3355_p7 }
  0x1d   : > { %p3358_p9 = pnand %p3357_p10, %p3351_p3 }
  0x1f   : > { %3361 = shalt.err (!%p3358_p9)
}
  0x20   : > { %s3362_s22 = scalar_lea.vmem %s3552_s6, 1024  ;;  %s3445_s26 = smov [#allocation2]  }
  0x21   : > { %p3363_p0 = scmp.ne.s32.totalorder %s3552_s6, %s3362_s22  ;;  %s3367_s27 = sshll.u32 %s3445_s26, 4  ;;  %s3368_s27 = int_to_ptr.vmem [resolvable:$false] %s3367_s27 }
  0x22   : > { %s3369_s28 = scalar_lea.vmem %s3368_s27, 2048  ;;  %p3370_p11 = scmp.lt.s32.totalorder %s3552_s6, %s3368_s27 }
  0x23   : > { %p3365_p2 = pnand %p3363_p0, %p3349_p1  ;;  %p3371_p4 = scmp.lt.s32.totalorder %s3369_s28, %s3362_s22 }
  0x25   : > { %p3366_p12 = pneg %p3365_p2  ;;  %p3372_p5 = por %p3371_p4, %p3370_p11 }
  0x27   : > { %p3373_p7 = pnand %p3372_p5, %p3366_p12 }
  0x29   : > { %3376 = shalt.err (!%p3373_p7)
}
  0x2a   : > { %s3446_s29 = smov 128   ;;  %s3447_s30 = smov 8  }
  0x2b   : > { %3284 = dma.hbm_to_vmem [thread:$0]  (!%p3548_p13), %s3544_s4, 1024, %s3552_s6, %s3554_s8, %s3446_s29, %s3446_s29, %s3447_s30  }
  0x2c   : > { %p3260_p9 = scmp.ge.s32.totalorder %s3443_s15, 1  ;;  %p156_p1 = scmp.lt.s32.totalorder %s3443_s15, 3 }
  0x2e   : > { %p157_p3 = pnand %p3260_p9, %p156_p1 }
  0x30   : > { %160 = sbr.rel (%p157_p3) target bundleno = 1009 (0x3f1), region = 32 }
  0x37   : > { %s3585_s5 = sand.u32 1, %s3435_s13  }
  0x38   : > { %s3261_s9 = sshll.u32 %s3585_s5, 6  ;;  %s163_s10 = scalar_lea.sflag [#allocation3], %s3585_s5 }
  0x39   : > { %s3589_s11 = scalar_lea.vmem [#allocation2], %s3261_s9 }
  0x3a   : > { %3422 = dma.done.wait (%p3524_p6), %s163_s10, 1024  }
  0x3b   : > { %3424 = vsyncadd (%p3524_p6), %s163_s10, 4294966272  ;;  %v5278_v0 = vlaneseq  ;;  %v3448_v1 = vmov 1983009808   ;;  %v192_v6 = vld [vmem:[%s3589_s11] sm:$0xff]  ;;  %v193_v7 = vld [vmem:[%s3589_s11 + $0x8] sm:$0xff]  ;;  %s3449_s23 = smov 126  }
  0x3c   : > { %v210_v2 = vunpack.c.l.s4 %v3448_v1  ;;  %v208_v9 = vcombine.high %v192_v6, %v192_v6  ;;  %v225_v13 = vcombine.high %v193_v7, %v193_v7  ;;  %v194_v17 = vld [vmem:[%s3589_s11 + $0x10] sm:$0xff]  ;;  %v195_v23 = vld [vmem:[%s3589_s11 + $0x18] sm:$0xff]  ;;  %v196_v29 = vld [vmem:[%s3589_s11 + $0x20] sm:$0xff]  ;;  %s3450_s4 = smov 124   ;;  %s3451_s6 = smov 122   ;;  %vm3459_vm0 = vmmov 0  }
  0x3d   : > { %v3596_v3 = vshrl.u32 %v5278_v0, 7  ;;  %v242_v20 = vcombine.high %v194_v17, %v194_v17  ;;  %v259_v26 = vcombine.high %v195_v23, %v195_v23  ;;  %v276_v32 = vcombine.high %v196_v29, %v196_v29  ;;  %v197_v35 = vld [vmem:[%s3589_s11 + $0x28] sm:$0xff]  ;;  %v198_v41 = vld [vmem:[%s3589_s11 + $0x30] sm:$0xff]  ;;  %v199_v47 = vld [vmem:[%s3589_s11 + $0x38] sm:$0xff]  ;;  %s3452_s7 = smov 120   ;;  %s3453_s8 = smov 118  }
  0x3e   : > { %v211_v4 = vunpack.c.0.s8 %v210_v2  ;;  %v293_v38 = vcombine.high %v197_v35, %v197_v35  ;;  %v310_v44 = vcombine.high %v198_v41, %v198_v41  ;;  %v327_v50 = vcombine.high %v199_v47, %v199_v47  ;;  %s3454_s17 = smov 116   ;;  %s3455_s19 = smov 114  }
  0x3f   : > { %5317 = vst [vmem:[#allocation8_spill] sm:$0xff] %v3596_v3  ;;  %vm2952_vm1 = vcmask 130112   ;;  %vm2959_vm2 = vcmask 195712   ;;  %vm2966_vm3 = vcmask 261312   ;;  %vm2973_vm4 = vcmask 326912   ;;  %s3262_s28 = sshll.u32 %s3585_s5, 3 }
  0x40   : > { %v3599_v5 = vsub.s32 %v211_v4, %v3596_v3  ;;  %vm2980_vm5 = vcmask 392512   ;;  %vm2987_vm6 = vcmask 458112   ;;  %vm2994_vm7 = vcmask 523712   ;;  %s3265_s29 = sshll.u32 %s3502_s16, 7  ;;  %s188_s30 = scalar_lea.vmem [#allocation5], %s3262_s28 }
  0x41   : > { %vm3113_vm8 = vcmask 1041409   ;;  %vm3115_vm9 = vcmask 1042434   ;;  %vm3117_vm10 = vcmask 1043459   ;;  %vm3124_vm11 = vcmask 1041408   ;;  %s3184_s9 = sshll.u32 %s188_s30, 4  ;;  %s3171_s16 = scalar_lea.sflag [#allocation4], %s3585_s5  ;;  %s5231_s9 = int_to_ptr.vmem [resolvable:$true] %s3184_s9 }
  0x42   : > { %5318 = vst [vmem:[#allocation9_spill] sm:$0xff] %v3599_v5  ;;  %v3604_v8 = vrot.slane %v192_v6, %v3599_v5  ;;  %v3607_v10 = vrot.slane %v193_v7, %v3599_v5  ;;  %v3612_v11 = vrot.slane %v208_v9, %v3599_v5  ;;  %v3633_v16 = vrot.slane %v225_v13, %v3599_v5  ;;  %p5611_p11 = scmp.ne.s32.totalorder %s5314_s24, 0 }
  0x43   : > { %v3645_v19 = vrot.slane %v194_v17, %v3599_v5  ;;  %v3656_v22 = vrot.slane %v242_v20, %v3599_v5  ;;  %v3668_v25 = vrot.slane %v195_v23, %v3599_v5  ;;  %v3679_v28 = vrot.slane %v259_v26, %v3599_v5 }
  0x44   : > { %376 = vrot.lane.b32.xlu0 %v3604_v8, %s3449_s23  ;;  %380 = vrot.lane.b32.xlu1 %v3612_v11, %s3449_s23  ;;  %v3618_v12 = vcombine.high %v3607_v10, %v3607_v10  ;;  %v3624_v14 = vcombine.high %v3604_v8, %v3604_v8  ;;  %v3630_v15 = vcombine.high %v3612_v11, %v3612_v11  ;;  %vm3120_vm12 = vcmask 31744  }
  0x45   : > { %5319 = vst [vmem:[#allocation10_spill] sm:$0xff] %v3633_v16  ;;  %v3642_v18 = vcombine.high %v3633_v16, %v3633_v16  ;;  %v3653_v21 = vcombine.high %v3645_v19, %v3645_v19  ;;  %v3665_v24 = vcombine.high %v3656_v22, %v3656_v22  ;;  %v3676_v27 = vcombine.high %v3668_v25, %v3668_v25 }
  0x46   : > { %5321 = vst [vmem:[#allocation12_spill] sm:$0xff] %v3679_v28  ;;  %v3688_v30 = vcombine.high %v3679_v28, %v3679_v28  ;;  %v3691_v31 = vrot.slane %v196_v29, %v3599_v5  ;;  %v3702_v34 = vrot.slane %v276_v32, %v3599_v5  ;;  %v3714_v37 = vrot.slane %v197_v35, %v3599_v5 }
  0x47   : > { %5320 = vst [vmem:[#allocation11_spill] sm:$0xff] %v3642_v18  ;;  %v3725_v40 = vrot.slane %v293_v38, %v3599_v5  ;;  %v3737_v43 = vrot.slane %v198_v41, %v3599_v5  ;;  %v3748_v46 = vrot.slane %v310_v44, %v3599_v5  ;;  %v3760_v49 = vrot.slane %v199_v47, %v3599_v5 }
  0x48   : > { %384 = vrot.lane.b32.xlu0 %v3607_v10, %s3449_s23  ;;  %386 = vrot.lane.b32.xlu1 %v3618_v12, %s3449_s23  ;;  %5322 = vst [vmem:[#allocation13_spill] sm:$0xff] %v3688_v30  ;;  %v3699_v33 = vcombine.high %v3691_v31, %v3691_v31  ;;  %v3711_v36 = vcombine.high %v3702_v34, %v3702_v34  ;;  %5323 = vst [vmem:[#allocation14_spill] sm:$0xff] %v3714_v37  ;;  %vm3168_vm13 = vcmask 523264  }
  0x49   : > { %v3722_v39 = vcombine.high %v3714_v37, %v3714_v37  ;;  %5325 = vst [vmem:[#allocation16_spill] sm:$0xff] %v3725_v40  ;;  %v3734_v42 = vcombine.high %v3725_v40, %v3725_v40  ;;  %v3745_v45 = vcombine.high %v3737_v43, %v3737_v43  ;;  %v3757_v48 = vcombine.high %v3748_v46, %v3748_v46 }
  0x4a   : > { %5328 = vst [vmem:[#allocation19_spill] sm:$0xff] %v3760_v49  ;;  %v3768_v51 = vcombine.high %v3760_v49, %v3760_v49  ;;  %v3771_v52 = vrot.slane %v327_v50, %v3599_v5 }
  0x4b   : > { %5324 = vst [vmem:[#allocation15_spill] sm:$0xff] %v3722_v39  ;;  %5326 = vst [vmem:[#allocation17_spill] sm:$0xff] %v3734_v42 }
  0x4c   : > { %378 = vrot.lane.b32.xlu0 %v3624_v14, %s3449_s23  ;;  %382 = vrot.lane.b32.xlu1 %v3630_v15, %s3449_s23  ;;  %5327 = vst [vmem:[#allocation18_spill] sm:$0xff] %v3757_v48  ;;  %5329 = vst [vmem:[#allocation20_spill] sm:$0xff] %v3768_v51  ;;  %v3779_v53 = vcombine.high %v3771_v52, %v3771_v52 }
  0x4d   : > { %5330 = vst [vmem:[#allocation21_spill] sm:$0xff] %v3771_v52 }
  0x4e   : > { %5331 = vst [vmem:[#allocation22_spill] sm:$0xff] %v3779_v53 }
  0x50   : > { %388 = vrot.lane.b32.xlu0 %v3633_v16, %s3449_s23  ;;  %390 = vrot.lane.b32.xlu1 %v3642_v18, %s3449_s23 }
  0x54   : > { %392 = vrot.lane.b32.xlu0 %v3645_v19, %s3449_s23  ;;  %394 = vrot.lane.b32.xlu1 %v3653_v21, %s3449_s23 }
  0x58   : > { %396 = vrot.lane.b32.xlu0 %v3656_v22, %s3449_s23  ;;  %398 = vrot.lane.b32.xlu1 %v3665_v24, %s3449_s23 }
  0x5c   : > { %400 = vrot.lane.b32.xlu0 %v3668_v25, %s3449_s23  ;;  %402 = vrot.lane.b32.xlu1 %v3676_v27, %s3449_s23 }
  0x60   : > { %404 = vrot.lane.b32.xlu0 %v3679_v28, %s3449_s23  ;;  %406 = vrot.lane.b32.xlu1 %v3688_v30, %s3449_s23 }
  0x64   : > { %408 = vrot.lane.b32.xlu0 %v3691_v31, %s3449_s23  ;;  %410 = vrot.lane.b32.xlu1 %v3699_v33, %s3449_s23 }
  0x68   : > { %412 = vrot.lane.b32.xlu0 %v3702_v34, %s3449_s23  ;;  %414 = vrot.lane.b32.xlu1 %v3711_v36, %s3449_s23 }
  0x6c   : > { %416 = vrot.lane.b32.xlu0 %v3714_v37, %s3449_s23  ;;  %418 = vrot.lane.b32.xlu1 %v3722_v39, %s3449_s23 }
  0x70   : > { %420 = vrot.lane.b32.xlu0 %v3725_v40, %s3449_s23  ;;  %422 = vrot.lane.b32.xlu1 %v3734_v42, %s3449_s23 }
  0x74   : > { %424 = vrot.lane.b32.xlu0 %v3737_v43, %s3449_s23  ;;  %426 = vrot.lane.b32.xlu1 %v3745_v45, %s3449_s23 }
  0x78   : > { %428 = vrot.lane.b32.xlu0 %v3748_v46, %s3449_s23  ;;  %430 = vrot.lane.b32.xlu1 %v3757_v48, %s3449_s23 }
  0x7c   : > { %432 = vrot.lane.b32.xlu0 %v3760_v49, %s3449_s23  ;;  %434 = vrot.lane.b32.xlu1 %v3768_v51, %s3449_s23 }
  0x80   : > { %436 = vrot.lane.b32.xlu0 %v3771_v52, %s3449_s23  ;;  %438 = vrot.lane.b32.xlu1 %v3779_v53, %s3449_s23  ;;  %s5229_s23 = scalar_lea.hbm %s5276_s3, %s3265_s29 }
  0x84   : > { %472 = vrot.lane.b32.xlu0 %v3604_v8, %s3450_s4  ;;  %474 = vrot.lane.b32.xlu1 %v3624_v14, %s3450_s4 }
  0x88   : > { %476 = vrot.lane.b32.xlu0 %v3612_v11, %s3450_s4  ;;  %478 = vrot.lane.b32.xlu1 %v3630_v15, %s3450_s4 }
  0x8c   : > { %480 = vrot.lane.b32.xlu0 %v3607_v10, %s3450_s4  ;;  %482 = vrot.lane.b32.xlu1 %v3618_v12, %s3450_s4 }
  0x90   : > { %484 = vrot.lane.b32.xlu0 %v3633_v16, %s3450_s4  ;;  %486 = vrot.lane.b32.xlu1 %v3642_v18, %s3450_s4 }
  0x94   : > { %488 = vrot.lane.b32.xlu0 %v3645_v19, %s3450_s4  ;;  %490 = vrot.lane.b32.xlu1 %v3653_v21, %s3450_s4 }
  0x98   : > { %492 = vrot.lane.b32.xlu0 %v3656_v22, %s3450_s4  ;;  %494 = vrot.lane.b32.xlu1 %v3665_v24, %s3450_s4 }
  0x9c   : > { %496 = vrot.lane.b32.xlu0 %v3668_v25, %s3450_s4  ;;  %498 = vrot.lane.b32.xlu1 %v3676_v27, %s3450_s4 }
  0xa0   : > { %500 = vrot.lane.b32.xlu0 %v3679_v28, %s3450_s4  ;;  %502 = vrot.lane.b32.xlu1 %v3688_v30, %s3450_s4 }
  0xa4   : > { %504 = vrot.lane.b32.xlu0 %v3691_v31, %s3450_s4  ;;  %506 = vrot.lane.b32.xlu1 %v3699_v33, %s3450_s4 }
  0xa8   : > { %508 = vrot.lane.b32.xlu0 %v3702_v34, %s3450_s4  ;;  %510 = vrot.lane.b32.xlu1 %v3711_v36, %s3450_s4 }
  0xac   : > { %512 = vrot.lane.b32.xlu0 %v3714_v37, %s3450_s4  ;;  %514 = vrot.lane.b32.xlu1 %v3722_v39, %s3450_s4 }
  0xb0   : > { %516 = vrot.lane.b32.xlu0 %v3725_v40, %s3450_s4  ;;  %518 = vrot.lane.b32.xlu1 %v3734_v42, %s3450_s4 }
  0xb4   : > { %520 = vrot.lane.b32.xlu0 %v3737_v43, %s3450_s4  ;;  %522 = vrot.lane.b32.xlu1 %v3745_v45, %s3450_s4 }
  0xb6   : > { %v3835_v54 = vpop.permute.xlu0 %376  ;;  %v3841_v55 = vpop.permute.xlu1 %380 }
  0xb8   : > { %524 = vrot.lane.b32.xlu0 %v3748_v46, %s3450_s4  ;;  %526 = vrot.lane.b32.xlu1 %v3757_v48, %s3450_s4 }
  0xba   : > { %v3843_v56 = vpop.permute.xlu0 %384  ;;  %v3849_v57 = vpop.permute.xlu1 %386 }
  0xbc   : > { %528 = vrot.lane.b32.xlu0 %v3760_v49, %s3450_s4  ;;  %530 = vrot.lane.b32.xlu1 %v3768_v51, %s3450_s4 }
  0xbe   : > { %v3851_v58 = vpop.permute.xlu0 %378  ;;  %v3857_v59 = vpop.permute.xlu1 %382 }
  0xc0   : > { %532 = vrot.lane.b32.xlu0 %v3771_v52, %s3450_s4  ;;  %534 = vrot.lane.b32.xlu1 %v3779_v53, %s3450_s4  ;;  %s3377_s4 = scalar_lea.vmem %s5231_s9, 128 }
  0xc1   : > { %p3378_p6 = scmp.ne.s32.totalorder %s5231_s9, %s3377_s4 }
  0xc2   : > { %v3859_v60 = vpop.permute.xlu0 %388  ;;  %v3865_v61 = vpop.permute.xlu1 %390 }
  0xc3   : > { %5332 = vst [vmem:[#allocation23_spill] sm:$0xff] %v3859_v60  ;;  %5333 = vst [vmem:[#allocation24_spill] sm:$0xff] %v3865_v61  ;;  %p3379_p12 = pnand %p3378_p6, %p5611_p11 }
  0xc4   : > { %568 = vrot.lane.b32.xlu0 %v3604_v8, %s3451_s6  ;;  %570 = vrot.lane.b32.xlu1 %v3624_v14, %s3451_s6 }
  0xc5   : > { %p3380_p13 = pneg %p3379_p12 }
  0xc6   : > { %v3867_v62 = vpop.permute.xlu0 %392  ;;  %v3873_v63 = vpop.permute.xlu1 %394 }
  0xc8   : > { %572 = vrot.lane.b32.xlu0 %v3612_v11, %s3451_s6  ;;  %574 = vrot.lane.b32.xlu1 %v3630_v15, %s3451_s6 }
  0xca   : > { %v3875_v1 = vpop.permute.xlu0 %396  ;;  %v3881_v2 = vpop.permute.xlu1 %398 }
  0xcc   : > { %576 = vrot.lane.b32.xlu0 %v3607_v10, %s3451_s6  ;;  %578 = vrot.lane.b32.xlu1 %v3618_v12, %s3451_s6 }
  0xce   : > { %v3883_v4 = vpop.permute.xlu0 %400  ;;  %v3889_v6 = vpop.permute.xlu1 %402 }
  0xd0   : > { %580 = vrot.lane.b32.xlu0 %v3633_v16, %s3451_s6  ;;  %582 = vrot.lane.b32.xlu1 %v3642_v18, %s3451_s6 }
  0xd2   : > { %v3891_v7 = vpop.permute.xlu0 %404  ;;  %v3897_v9 = vpop.permute.xlu1 %406 }
  0xd3   : > { %5334 = vst [vmem:[#allocation25_spill] sm:$0xff] %v3891_v7  ;;  %5335 = vst [vmem:[#allocation26_spill] sm:$0xff] %v3897_v9 }
  0xd4   : > { %584 = vrot.lane.b32.xlu0 %v3645_v19, %s3451_s6  ;;  %586 = vrot.lane.b32.xlu1 %v3653_v21, %s3451_s6 }
  0xd6   : > { %v3899_v13 = vpop.permute.xlu0 %408  ;;  %v3905_v17 = vpop.permute.xlu1 %410 }
  0xd8   : > { %588 = vrot.lane.b32.xlu0 %v3656_v22, %s3451_s6  ;;  %590 = vrot.lane.b32.xlu1 %v3665_v24, %s3451_s6 }
  0xda   : > { %v3907_v20 = vpop.permute.xlu0 %412  ;;  %v3913_v23 = vpop.permute.xlu1 %414 }
  0xdc   : > { %592 = vrot.lane.b32.xlu0 %v3668_v25, %s3451_s6  ;;  %594 = vrot.lane.b32.xlu1 %v3676_v27, %s3451_s6 }
  0xde   : > { %v3915_v26 = vpop.permute.xlu0 %416  ;;  %v3921_v29 = vpop.permute.xlu1 %418 }
  0xdf   : > { %5336 = vst [vmem:[#allocation27_spill] sm:$0xff] %v3915_v26  ;;  %5337 = vst [vmem:[#allocation28_spill] sm:$0xff] %v3921_v29 }
  0xe0   : > { %596 = vrot.lane.b32.xlu0 %v3679_v28, %s3451_s6  ;;  %598 = vrot.lane.b32.xlu1 %v3688_v30, %s3451_s6 }
  0xe2   : > { %v3923_v32 = vpop.permute.xlu0 %420  ;;  %v3929_v35 = vpop.permute.xlu1 %422 }
  0xe3   : > { %5338 = vst [vmem:[#allocation29_spill] sm:$0xff] %v3923_v32  ;;  %5339 = vst [vmem:[#allocation30_spill] sm:$0xff] %v3929_v35 }
  0xe4   : > { %600 = vrot.lane.b32.xlu0 %v3691_v31, %s3451_s6  ;;  %602 = vrot.lane.b32.xlu1 %v3699_v33, %s3451_s6 }
  0xe6   : > { %v3931_v38 = vpop.permute.xlu0 %424  ;;  %v3937_v41 = vpop.permute.xlu1 %426 }
  0xe8   : > { %604 = vrot.lane.b32.xlu0 %v3702_v34, %s3451_s6  ;;  %606 = vrot.lane.b32.xlu1 %v3711_v36, %s3451_s6 }
  0xea   : > { %v3939_v44 = vpop.permute.xlu0 %428  ;;  %v3945_v47 = vpop.permute.xlu1 %430 }
  0xeb   : > { %5340 = vst [vmem:[#allocation31_spill] sm:$0xff] %v3939_v44  ;;  %5341 = vst [vmem:[#allocation32_spill] sm:$0xff] %v3945_v47 }
  0xec   : > { %608 = vrot.lane.b32.xlu0 %v3714_v37, %s3451_s6  ;;  %610 = vrot.lane.b32.xlu1 %v3722_v39, %s3451_s6 }
  0xee   : > { %v3947_v50 = vpop.permute.xlu0 %432  ;;  %v3953_v0 = vpop.permute.xlu1 %434 }
  0xef   : > { %5342 = vst [vmem:[#allocation33_spill] sm:$0xff] %v3947_v50  ;;  %5343 = vst [vmem:[#allocation34_spill] sm:$0xff] %v3953_v0 }
  0xf0   : > { %612 = vrot.lane.b32.xlu0 %v3725_v40, %s3451_s6  ;;  %614 = vrot.lane.b32.xlu1 %v3734_v42, %s3451_s6 }
  0xf2   : > { %v3955_v35 = vpop.permute.xlu0 %436  ;;  %v3961_v32 = vpop.permute.xlu1 %438 }
  0xf3   : > { %5344 = vst [vmem:[#allocation35_spill] sm:$0xff] %v3955_v35  ;;  %5345 = vst [vmem:[#allocation36_spill] sm:$0xff] %v3961_v32 }
  0xf4   : > { %616 = vrot.lane.b32.xlu0 %v3737_v43, %s3451_s6  ;;  %618 = vrot.lane.b32.xlu1 %v3745_v45, %s3451_s6 }
  0xf6   : > { %v3963_v9 = vpop.permute.xlu0 %472  ;;  %v3969_v50 = vpop.permute.xlu1 %474 }
  0xf8   : > { %620 = vrot.lane.b32.xlu0 %v3748_v46, %s3451_s6  ;;  %622 = vrot.lane.b32.xlu1 %v3757_v48, %s3451_s6 }
  0xfa   : > { %v3971_v0 = vpop.permute.xlu0 %476  ;;  %v3977_v35 = vpop.permute.xlu1 %478 }
  0xfc   : > { %624 = vrot.lane.b32.xlu0 %v3760_v49, %s3451_s6  ;;  %626 = vrot.lane.b32.xlu1 %v3768_v51, %s3451_s6 }
  0xfe   : > { %v3979_v32 = vpop.permute.xlu0 %480  ;;  %v3985_v7 = vpop.permute.xlu1 %482 }
  0xff   : > { %5346 = vst [vmem:[#allocation37_spill] sm:$0xff] %v3979_v32  ;;  %5347 = vst [vmem:[#allocation38_spill] sm:$0xff] %v3985_v7 }
 0x100   : > { %628 = vrot.lane.b32.xlu0 %v3771_v52, %s3451_s6  ;;  %630 = vrot.lane.b32.xlu1 %v3779_v53, %s3451_s6  ;;  %s3460_s6 = smov [#allocation5]  }
 0x102   : > { %v3987_v61 = vpop.permute.xlu0 %484  ;;  %v3993_v60 = vpop.permute.xlu1 %486 }
 0x103   : > { %5348 = vst [vmem:[#allocation39_spill] sm:$0xff] %v3987_v61  ;;  %5349 = vst [vmem:[#allocation40_spill] sm:$0xff] %v3993_v60 }
 0x104   : > { %664 = vrot.lane.b32.xlu0 %v3604_v8, %s3452_s7  ;;  %666 = vrot.lane.b32.xlu1 %v3624_v14, %s3452_s7 }
 0x106   : > { %v3995_v29 = vpop.permute.xlu0 %488  ;;  %v4001_v26 = vpop.permute.xlu1 %490 }
 0x108   : > { %668 = vrot.lane.b32.xlu0 %v3612_v11, %s3452_s7  ;;  %670 = vrot.lane.b32.xlu1 %v3630_v15, %s3452_s7 }
 0x10a   : > { %v4003_v61 = vpop.permute.xlu0 %492  ;;  %v4009_v53 = vpop.permute.xlu1 %494 }
 0x10b   : > { %5350 = vst [vmem:[#allocation41_spill] sm:$0xff] %v4003_v61  ;;  %5351 = vst [vmem:[#allocation42_spill] sm:$0xff] %v4009_v53 }
 0x10c   : > { %672 = vrot.lane.b32.xlu0 %v3607_v10, %s3452_s7  ;;  %674 = vrot.lane.b32.xlu1 %v3618_v12, %s3452_s7 }
 0x10e   : > { %v4011_v60 = vpop.permute.xlu0 %496  ;;  %v4017_v52 = vpop.permute.xlu1 %498 }
 0x10f   : > { %5352 = vst [vmem:[#allocation43_spill] sm:$0xff] %v4011_v60  ;;  %5353 = vst [vmem:[#allocation44_spill] sm:$0xff] %v4017_v52 }
 0x110   : > { %676 = vrot.lane.b32.xlu0 %v3633_v16, %s3452_s7  ;;  %678 = vrot.lane.b32.xlu1 %v3642_v18, %s3452_s7 }
 0x112   : > { %v4019_v5 = vpop.permute.xlu0 %500  ;;  %v4025_v47 = vpop.permute.xlu1 %502 }
 0x113   : > { %5354 = vst [vmem:[#allocation45_spill] sm:$0xff] %v4019_v5  ;;  %5355 = vst [vmem:[#allocation46_spill] sm:$0xff] %v4025_v47 }
 0x114   : > { %680 = vrot.lane.b32.xlu0 %v3645_v19, %s3452_s7  ;;  %682 = vrot.lane.b32.xlu1 %v3653_v21, %s3452_s7 }
 0x116   : > { %v4027_v42 = vpop.permute.xlu0 %504  ;;  %v4033_v52 = vpop.permute.xlu1 %506 }
 0x117   : > { %5356 = vst [vmem:[#allocation47_spill] sm:$0xff] %v4027_v42  ;;  %5357 = vst [vmem:[#allocation48_spill] sm:$0xff] %v4033_v52 }
 0x118   : > { %760 = vrot.lane.b32.xlu0 %v3604_v8, %s3453_s8  ;;  %762 = vrot.lane.b32.xlu1 %v3624_v14, %s3453_s8 }
 0x11a   : > { %v4035_v5 = vpop.permute.xlu0 %508  ;;  %v4041_v47 = vpop.permute.xlu1 %510 }
 0x11b   : > { %5358 = vst [vmem:[#allocation49_spill] sm:$0xff] %v4035_v5  ;;  %5359 = vst [vmem:[#allocation50_spill] sm:$0xff] %v4041_v47 }
 0x11c   : > { %776 = vrot.lane.b32.xlu0 %v3645_v19, %s3453_s8  ;;  %778 = vrot.lane.b32.xlu1 %v3653_v21, %s3453_s8 }
 0x11e   : > { %v4043_v60 = vpop.permute.xlu0 %512  ;;  %v4049_v52 = vpop.permute.xlu1 %514 }
 0x11f   : > { %5360 = vst [vmem:[#allocation51_spill] sm:$0xff] %v4043_v60  ;;  %5361 = vst [vmem:[#allocation52_spill] sm:$0xff] %v4049_v52 }
 0x120   : > { %856 = vrot.lane.b32.xlu0 %v3604_v8, %s3454_s17  ;;  %858 = vrot.lane.b32.xlu1 %v3624_v14, %s3454_s17 }
 0x122   : > { %v4051_v5 = vpop.permute.xlu0 %516  ;;  %v4057_v47 = vpop.permute.xlu1 %518 }
 0x123   : > { %5362 = vst [vmem:[#allocation53_spill] sm:$0xff] %v4051_v5  ;;  %5363 = vst [vmem:[#allocation54_spill] sm:$0xff] %v4057_v47 }
 0x124   : > { %872 = vrot.lane.b32.xlu0 %v3645_v19, %s3454_s17  ;;  %874 = vrot.lane.b32.xlu1 %v3653_v21, %s3454_s17 }
 0x126   : > { %v4059_v60 = vpop.permute.xlu0 %520  ;;  %v4065_v52 = vpop.permute.xlu1 %522 }
 0x127   : > { %5364 = vst [vmem:[#allocation55_spill] sm:$0xff] %v4059_v60  ;;  %5365 = vst [vmem:[#allocation56_spill] sm:$0xff] %v4065_v52 }
 0x128   : > { %952 = vrot.lane.b32.xlu0 %v3604_v8, %s3455_s19  ;;  %954 = vrot.lane.b32.xlu1 %v3624_v14, %s3455_s19 }
 0x12a   : > { %v4067_v5 = vpop.permute.xlu0 %524  ;;  %v4073_v47 = vpop.permute.xlu1 %526 }
 0x12b   : > { %5366 = vst [vmem:[#allocation57_spill] sm:$0xff] %v4067_v5  ;;  %5367 = vst [vmem:[#allocation58_spill] sm:$0xff] %v4073_v47 }
 0x12c   : > { %968 = vrot.lane.b32.xlu0 %v3645_v19, %s3455_s19  ;;  %970 = vrot.lane.b32.xlu1 %v3653_v21, %s3455_s19 }
 0x12e   : > { %v4075_v60 = vpop.permute.xlu0 %528  ;;  %v4081_v42 = vpop.permute.xlu1 %530 }
 0x12f   : > { %5368 = vst [vmem:[#allocation59_spill] sm:$0xff] %v4075_v60  ;;  %5369 = vst [vmem:[#allocation60_spill] sm:$0xff] %v4081_v42 }
 0x130   : > { %684 = vrot.lane.b32.xlu0 %v3656_v22, %s3452_s7  ;;  %686 = vrot.lane.b32.xlu1 %v3665_v24, %s3452_s7 }
 0x132   : > { %v4083_v52 = vpop.permute.xlu0 %532  ;;  %v4089_v5 = vpop.permute.xlu1 %534 }
 0x133   : > { %5370 = vst [vmem:[#allocation61_spill] sm:$0xff] %v4083_v52  ;;  %5371 = vst [vmem:[#allocation62_spill] sm:$0xff] %v4089_v5 }
 0x134   : > { %696 = vrot.lane.b32.xlu0 %v3691_v31, %s3452_s7  ;;  %698 = vrot.lane.b32.xlu1 %v3699_v33, %s3452_s7 }
 0x136   : > { %v4091_v47 = vpop.permute.xlu0 %568  ;;  %v4097_v60 = vpop.permute.xlu1 %570 }
 0x138   : > { %764 = vrot.lane.b32.xlu0 %v3612_v11, %s3453_s8  ;;  %766 = vrot.lane.b32.xlu1 %v3630_v15, %s3453_s8 }
 0x13a   : > { %v4099_v42 = vpop.permute.xlu0 %572  ;;  %v4105_v52 = vpop.permute.xlu1 %574 }
 0x13c   : > { %780 = vrot.lane.b32.xlu0 %v3656_v22, %s3453_s8  ;;  %782 = vrot.lane.b32.xlu1 %v3665_v24, %s3453_s8 }
 0x13e   : > { %v4107_v5 = vpop.permute.xlu0 %576  ;;  %v4113_v40 = vpop.permute.xlu1 %578 }
 0x13f   : > { %5372 = vst [vmem:[#allocation63_spill] sm:$0xff] %v4107_v5  ;;  %5373 = vst [vmem:[#allocation64_spill] sm:$0xff] %v4113_v40 }
 0x140   : > { %792 = vrot.lane.b32.xlu0 %v3691_v31, %s3453_s8  ;;  %794 = vrot.lane.b32.xlu1 %v3699_v33, %s3453_s8 }
 0x142   : > { %v4115_v53 = vpop.permute.xlu0 %580  ;;  %v4121_v61 = vpop.permute.xlu1 %582 }
 0x143   : > { %5374 = vst [vmem:[#allocation65_spill] sm:$0xff] %v4115_v53  ;;  %5375 = vst [vmem:[#allocation66_spill] sm:$0xff] %v4121_v61 }
 0x144   : > { %860 = vrot.lane.b32.xlu0 %v3612_v11, %s3454_s17  ;;  %862 = vrot.lane.b32.xlu1 %v3630_v15, %s3454_s17 }
 0x146   : > { %v4123_v7 = vpop.permute.xlu0 %584  ;;  %v4129_v32 = vpop.permute.xlu1 %586 }
 0x148   : > { %876 = vrot.lane.b32.xlu0 %v3656_v22, %s3454_s17  ;;  %878 = vrot.lane.b32.xlu1 %v3665_v24, %s3454_s17 }
 0x14a   : > { %v4131_v40 = vpop.permute.xlu0 %588  ;;  %v4137_v53 = vpop.permute.xlu1 %590 }
 0x14b   : > { %5376 = vst [vmem:[#allocation67_spill] sm:$0xff] %v4131_v40  ;;  %5377 = vst [vmem:[#allocation68_spill] sm:$0xff] %v4137_v53 }
 0x14c   : > { %888 = vrot.lane.b32.xlu0 %v3691_v31, %s3454_s17  ;;  %890 = vrot.lane.b32.xlu1 %v3699_v33, %s3454_s17 }
 0x14e   : > { %v4139_v61 = vpop.permute.xlu0 %592  ;;  %v4145_v5 = vpop.permute.xlu1 %594 }
 0x14f   : > { %5378 = vst [vmem:[#allocation69_spill] sm:$0xff] %v4139_v61  ;;  %5379 = vst [vmem:[#allocation70_spill] sm:$0xff] %v4145_v5 }
 0x150   : > { %956 = vrot.lane.b32.xlu0 %v3612_v11, %s3455_s19  ;;  %958 = vrot.lane.b32.xlu1 %v3630_v15, %s3455_s19 }
 0x152   : > { %v4147_v44 = vpop.permute.xlu0 %596  ;;  %v4153_v40 = vpop.permute.xlu1 %598 }
 0x153   : > { %5380 = vst [vmem:[#allocation71_spill] sm:$0xff] %v4147_v44  ;;  %5381 = vst [vmem:[#allocation72_spill] sm:$0xff] %v4153_v40 }
 0x154   : > { %972 = vrot.lane.b32.xlu0 %v3656_v22, %s3455_s19  ;;  %974 = vrot.lane.b32.xlu1 %v3665_v24, %s3455_s19 }
 0x156   : > { %v4155_v53 = vpop.permute.xlu0 %600  ;;  %v4161_v61 = vpop.permute.xlu1 %602 }
 0x157   : > { %5382 = vst [vmem:[#allocation73_spill] sm:$0xff] %v4155_v53  ;;  %5383 = vst [vmem:[#allocation74_spill] sm:$0xff] %v4161_v61 }
 0x158   : > { %984 = vrot.lane.b32.xlu0 %v3691_v31, %s3455_s19  ;;  %986 = vrot.lane.b32.xlu1 %v3699_v33, %s3455_s19 }
 0x15a   : > { %v4163_v5 = vpop.permute.xlu0 %604  ;;  %v4169_v44 = vpop.permute.xlu1 %606 }
 0x15b   : > { %5384 = vst [vmem:[#allocation75_spill] sm:$0xff] %v4163_v5  ;;  %5385 = vst [vmem:[#allocation76_spill] sm:$0xff] %v4169_v44 }
 0x15c   : > { %700 = vrot.lane.b32.xlu0 %v3702_v34, %s3452_s7  ;;  %702 = vrot.lane.b32.xlu1 %v3711_v36, %s3452_s7 }
 0x15e   : > { %v4171_v40 = vpop.permute.xlu0 %608  ;;  %v4177_v53 = vpop.permute.xlu1 %610 }
 0x15f   : > { %5386 = vst [vmem:[#allocation77_spill] sm:$0xff] %v4171_v40  ;;  %5387 = vst [vmem:[#allocation78_spill] sm:$0xff] %v4177_v53 }
 0x160   : > { %712 = vrot.lane.b32.xlu0 %v3737_v43, %s3452_s7  ;;  %714 = vrot.lane.b32.xlu1 %v3745_v45, %s3452_s7 }
 0x162   : > { %v4179_v61 = vpop.permute.xlu0 %612  ;;  %v4185_v5 = vpop.permute.xlu1 %614 }
 0x163   : > { %5388 = vst [vmem:[#allocation79_spill] sm:$0xff] %v4179_v61  ;;  %5389 = vst [vmem:[#allocation80_spill] sm:$0xff] %v4185_v5 }
 0x164   : > { %796 = vrot.lane.b32.xlu0 %v3702_v34, %s3453_s8  ;;  %798 = vrot.lane.b32.xlu1 %v3711_v36, %s3453_s8 }
 0x166   : > { %v4187_v44 = vpop.permute.xlu0 %616  ;;  %v4193_v40 = vpop.permute.xlu1 %618 }
 0x167   : > { %5390 = vst [vmem:[#allocation81_spill] sm:$0xff] %v4187_v44  ;;  %5391 = vst [vmem:[#allocation82_spill] sm:$0xff] %v4193_v40 }
 0x168   : > { %808 = vrot.lane.b32.xlu0 %v3737_v43, %s3453_s8  ;;  %810 = vrot.lane.b32.xlu1 %v3745_v45, %s3453_s8 }
 0x16a   : > { %v4195_v53 = vpop.permute.xlu0 %620  ;;  %v4201_v61 = vpop.permute.xlu1 %622 }
 0x16b   : > { %5392 = vst [vmem:[#allocation83_spill] sm:$0xff] %v4195_v53  ;;  %5393 = vst [vmem:[#allocation84_spill] sm:$0xff] %v4201_v61 }
 0x16c   : > { %892 = vrot.lane.b32.xlu0 %v3702_v34, %s3454_s17  ;;  %894 = vrot.lane.b32.xlu1 %v3711_v36, %s3454_s17 }
 0x16e   : > { %v4203_v5 = vpop.permute.xlu0 %624  ;;  %v4209_v44 = vpop.permute.xlu1 %626 }
 0x16f   : > { %5394 = vst [vmem:[#allocation85_spill] sm:$0xff] %v4203_v5  ;;  %5395 = vst [vmem:[#allocation86_spill] sm:$0xff] %v4209_v44 }
 0x170   : > { %904 = vrot.lane.b32.xlu0 %v3737_v43, %s3454_s17  ;;  %906 = vrot.lane.b32.xlu1 %v3745_v45, %s3454_s17 }
 0x172   : > { %v4211_v40 = vpop.permute.xlu0 %628  ;;  %v4217_v53 = vpop.permute.xlu1 %630 }
 0x173   : > { %5396 = vst [vmem:[#allocation87_spill] sm:$0xff] %v4211_v40  ;;  %5397 = vst [vmem:[#allocation88_spill] sm:$0xff] %v4217_v53 }
 0x174   : > { %988 = vrot.lane.b32.xlu0 %v3702_v34, %s3455_s19  ;;  %990 = vrot.lane.b32.xlu1 %v3711_v36, %s3455_s19 }
 0x176   : > { %v4219_v61 = vpop.permute.xlu0 %664  ;;  %v4225_v5 = vpop.permute.xlu1 %666 }
 0x177   : > { %5398 = vst [vmem:[#allocation89_spill] sm:$0xff] %v4219_v61  ;;  %5399 = vst [vmem:[#allocation90_spill] sm:$0xff] %v4225_v5 }
 0x178   : > { %1000 = vrot.lane.b32.xlu0 %v3737_v43, %s3455_s19  ;;  %1002 = vrot.lane.b32.xlu1 %v3745_v45, %s3455_s19 }
 0x17a   : > { %v4227_v44 = vpop.permute.xlu0 %668  ;;  %v4233_v40 = vpop.permute.xlu1 %670 }
 0x17b   : > { %5400 = vst [vmem:[#allocation91_spill] sm:$0xff] %v4227_v44  ;;  %5401 = vst [vmem:[#allocation92_spill] sm:$0xff] %v4233_v40  ;;  %v3456_v40 = vmov 0  }
 0x17c   : > { %688 = vrot.lane.b32.xlu0 %v3668_v25, %s3452_s7  ;;  %690 = vrot.lane.b32.xlu1 %v3676_v27, %s3452_s7 }
 0x17d   : > { %3338 = vset.pattern.permute.xlu1 %v3456_v40  ;;  %3337 = vset.pattern.permute.xlu0 %v3456_v40 }
 0x17e   : > { %v4235_v53 = vpop.permute.xlu0 %672  ;;  %v4241_v61 = vpop.permute.xlu1 %674 }
 0x17f   : > { %5402 = vst [vmem:[#allocation93_spill] sm:$0xff] %v4235_v53  ;;  %5403 = vst [vmem:[#allocation94_spill] sm:$0xff] %v4241_v61 }
 0x180   : > { %716 = vrot.lane.b32.xlu0 %v3748_v46, %s3452_s7  ;;  %718 = vrot.lane.b32.xlu1 %v3757_v48, %s3452_s7 }
 0x182   : > { %v4243_v5 = vpop.permute.xlu0 %676  ;;  %v4249_v44 = vpop.permute.xlu1 %678 }
 0x183   : > { %5404 = vst [vmem:[#allocation95_spill] sm:$0xff] %v4243_v5  ;;  %5405 = vst [vmem:[#allocation96_spill] sm:$0xff] %v4249_v44 }
 0x184   : > { %768 = vrot.lane.b32.xlu0 %v3607_v10, %s3453_s8  ;;  %770 = vrot.lane.b32.xlu1 %v3618_v12, %s3453_s8 }
 0x186   : > { %v4251_v53 = vpop.permute.xlu0 %680  ;;  %v4257_v5 = vpop.permute.xlu1 %682 }
 0x187   : > { %5406 = vst [vmem:[#allocation97_spill] sm:$0xff] %v4251_v53  ;;  %5407 = vst [vmem:[#allocation98_spill] sm:$0xff] %v4257_v5 }
 0x188   : > { %784 = vrot.lane.b32.xlu0 %v3668_v25, %s3453_s8  ;;  %786 = vrot.lane.b32.xlu1 %v3676_v27, %s3453_s8 }
 0x18a   : > { %v4259_v61 = vpop.permute.xlu0 %760  ;;  %v4265_v44 = vpop.permute.xlu1 %762 }
 0x18b   : > { %5408 = vst [vmem:[#allocation99_spill] sm:$0xff] %v4259_v61  ;;  %5409 = vst [vmem:[#allocation100_spill] sm:$0xff] %v4265_v44 }
 0x18c   : > { %812 = vrot.lane.b32.xlu0 %v3748_v46, %s3453_s8  ;;  %814 = vrot.lane.b32.xlu1 %v3757_v48, %s3453_s8 }
 0x18e   : > { %v4267_v40 = vpop.permute.xlu0 %776  ;;  %v4273_v53 = vpop.permute.xlu1 %778 }
 0x18f   : > { %5410 = vst [vmem:[#allocation101_spill] sm:$0xff] %v4267_v40  ;;  %5411 = vst [vmem:[#allocation102_spill] sm:$0xff] %v4273_v53 }
 0x190   : > { %864 = vrot.lane.b32.xlu0 %v3607_v10, %s3454_s17  ;;  %866 = vrot.lane.b32.xlu1 %v3618_v12, %s3454_s17 }
 0x192   : > { %v4275_v5 = vpop.permute.xlu0 %856  ;;  %v4281_v61 = vpop.permute.xlu1 %858 }
 0x193   : > { %5412 = vst [vmem:[#allocation103_spill] sm:$0xff] %v4275_v5  ;;  %5413 = vst [vmem:[#allocation104_spill] sm:$0xff] %v4281_v61 }
 0x194   : > { %880 = vrot.lane.b32.xlu0 %v3668_v25, %s3454_s17  ;;  %882 = vrot.lane.b32.xlu1 %v3676_v27, %s3454_s17 }
 0x196   : > { %v4283_v44 = vpop.permute.xlu0 %872  ;;  %v4289_v40 = vpop.permute.xlu1 %874 }
 0x197   : > { %5414 = vst [vmem:[#allocation105_spill] sm:$0xff] %v4283_v44  ;;  %5415 = vst [vmem:[#allocation106_spill] sm:$0xff] %v4289_v40 }
 0x198   : > { %908 = vrot.lane.b32.xlu0 %v3748_v46, %s3454_s17  ;;  %910 = vrot.lane.b32.xlu1 %v3757_v48, %s3454_s17 }
 0x19a   : > { %v4291_v53 = vpop.permute.xlu0 %952  ;;  %v4297_v5 = vpop.permute.xlu1 %954 }
 0x19b   : > { %5416 = vst [vmem:[#allocation107_spill] sm:$0xff] %v4291_v53  ;;  %5417 = vst [vmem:[#allocation108_spill] sm:$0xff] %v4297_v5 }
 0x19c   : > { %960 = vrot.lane.b32.xlu0 %v3607_v10, %s3455_s19  ;;  %962 = vrot.lane.b32.xlu1 %v3618_v12, %s3455_s19 }
 0x19e   : > { %v4299_v61 = vpop.permute.xlu0 %968  ;;  %v4305_v44 = vpop.permute.xlu1 %970 }
 0x19f   : > { %5418 = vst [vmem:[#allocation109_spill] sm:$0xff] %v4299_v61  ;;  %5419 = vst [vmem:[#allocation110_spill] sm:$0xff] %v4305_v44 }
 0x1a0   : > { %976 = vrot.lane.b32.xlu0 %v3668_v25, %s3455_s19  ;;  %978 = vrot.lane.b32.xlu1 %v3676_v27, %s3455_s19 }
 0x1a2   : > { %v4307_v40 = vpop.permute.xlu0 %684  ;;  %v4313_v53 = vpop.permute.xlu1 %686 }
 0x1a3   : > { %5420 = vst [vmem:[#allocation111_spill] sm:$0xff] %v4307_v40  ;;  %5421 = vst [vmem:[#allocation112_spill] sm:$0xff] %v4313_v53 }
 0x1a4   : > { %1004 = vrot.lane.b32.xlu0 %v3748_v46, %s3455_s19  ;;  %1006 = vrot.lane.b32.xlu1 %v3757_v48, %s3455_s19 }
 0x1a6   : > { %v4315_v5 = vpop.permute.xlu0 %696  ;;  %v4321_v61 = vpop.permute.xlu1 %698 }
 0x1a7   : > { %5422 = vst [vmem:[#allocation113_spill] sm:$0xff] %v4315_v5  ;;  %5423 = vst [vmem:[#allocation114_spill] sm:$0xff] %v4321_v61 }
 0x1a8   : > { %704 = vrot.lane.b32.xlu0 %v3714_v37, %s3452_s7  ;;  %706 = vrot.lane.b32.xlu1 %v3722_v39, %s3452_s7 }
 0x1aa   : > { %v4323_v44 = vpop.permute.xlu0 %764  ;;  %v4329_v40 = vpop.permute.xlu1 %766 }
 0x1ab   : > { %5424 = vst [vmem:[#allocation115_spill] sm:$0xff] %v4323_v44  ;;  %5425 = vst [vmem:[#allocation116_spill] sm:$0xff] %v4329_v40 }
 0x1ac   : > { %800 = vrot.lane.b32.xlu0 %v3714_v37, %s3453_s8  ;;  %802 = vrot.lane.b32.xlu1 %v3722_v39, %s3453_s8 }
 0x1ae   : > { %v4331_v53 = vpop.permute.xlu0 %780  ;;  %v4337_v5 = vpop.permute.xlu1 %782 }
 0x1af   : > { %5426 = vst [vmem:[#allocation117_spill] sm:$0xff] %v4331_v53  ;;  %5427 = vst [vmem:[#allocation118_spill] sm:$0xff] %v4337_v5 }
 0x1b0   : > { %896 = vrot.lane.b32.xlu0 %v3714_v37, %s3454_s17  ;;  %898 = vrot.lane.b32.xlu1 %v3722_v39, %s3454_s17 }
 0x1b2   : > { %v4339_v61 = vpop.permute.xlu0 %792  ;;  %v4345_v44 = vpop.permute.xlu1 %794 }
 0x1b3   : > { %5428 = vst [vmem:[#allocation119_spill] sm:$0xff] %v4339_v61  ;;  %5429 = vst [vmem:[#allocation120_spill] sm:$0xff] %v4345_v44 }
 0x1b4   : > { %992 = vrot.lane.b32.xlu0 %v3714_v37, %s3455_s19  ;;  %994 = vrot.lane.b32.xlu1 %v3722_v39, %s3455_s19 }
 0x1b6   : > { %v4347_v40 = vpop.permute.xlu0 %860  ;;  %v4353_v53 = vpop.permute.xlu1 %862 }
 0x1b7   : > { %5430 = vst [vmem:[#allocation121_spill] sm:$0xff] %v4347_v40  ;;  %5431 = vst [vmem:[#allocation122_spill] sm:$0xff] %v4353_v53  ;;  %v3457_v53 = vmov 1934713408  }
 0x1b8   : > { %692 = vrot.lane.b32.xlu0 %v3679_v28, %s3452_s7  ;;  %694 = vrot.lane.b32.xlu1 %v3688_v30, %s3452_s7 }
 0x1ba   : > { %v4355_v5 = vpop.permute.xlu0 %876  ;;  %v4361_v37 = vpop.permute.xlu1 %878 }
 0x1bb   : > { %5432 = vst [vmem:[#allocation123_spill] sm:$0xff] %v4355_v5  ;;  %5433 = vst [vmem:[#allocation124_spill] sm:$0xff] %v4361_v37 }
 0x1bc   : > { %720 = vrot.lane.b32.xlu0 %v3760_v49, %s3452_s7  ;;  %722 = vrot.lane.b32.xlu1 %v3768_v51, %s3452_s7 }
 0x1be   : > { %v4363_v61 = vpop.permute.xlu0 %888  ;;  %v4369_v39 = vpop.permute.xlu1 %890 }
 0x1bf   : > { %5434 = vst [vmem:[#allocation125_spill] sm:$0xff] %v4363_v61  ;;  %5435 = vst [vmem:[#allocation126_spill] sm:$0xff] %v4369_v39 }
 0x1c0   : > { %772 = vrot.lane.b32.xlu0 %v3633_v16, %s3453_s8  ;;  %774 = vrot.lane.b32.xlu1 %v3642_v18, %s3453_s8 }
 0x1c2   : > { %v4371_v44 = vpop.permute.xlu0 %956  ;;  %v4377_v40 = vpop.permute.xlu1 %958 }
 0x1c3   : > { %5436 = vst [vmem:[#allocation127_spill] sm:$0xff] %v4371_v44  ;;  %5437 = vst [vmem:[#allocation128_spill] sm:$0xff] %v4377_v40 }
 0x1c4   : > { %788 = vrot.lane.b32.xlu0 %v3679_v28, %s3453_s8  ;;  %790 = vrot.lane.b32.xlu1 %v3688_v30, %s3453_s8 }
 0x1c6   : > { %v4379_v5 = vpop.permute.xlu0 %972  ;;  %v4385_v61 = vpop.permute.xlu1 %974 }
 0x1c7   : > { %5438 = vst [vmem:[#allocation129_spill] sm:$0xff] %v4379_v5  ;;  %5439 = vst [vmem:[#allocation130_spill] sm:$0xff] %v4385_v61  ;;  %v1050_v5 = vunpack.c.l.s4 %v3457_v53 }
 0x1c8   : > { %816 = vrot.lane.b32.xlu0 %v3760_v49, %s3453_s8  ;;  %818 = vrot.lane.b32.xlu1 %v3768_v51, %s3453_s8 }
 0x1ca   : > { %v4387_v39 = vpop.permute.xlu0 %984  ;;  %v4393_v44 = vpop.permute.xlu1 %986 }
 0x1cb   : > { %5440 = vst [vmem:[#allocation131_spill] sm:$0xff] %v4387_v39  ;;  %5441 = vst [vmem:[#allocation132_spill] sm:$0xff] %v4393_v44  ;;  %v1051_v39 = vunpack.c.0.s8 %v1050_v5  ;;  %v1048_v44 = vcombine.low %v3604_v8, %v3835_v54  ;;  %v1304_v5 = vcombine.low %v3612_v11, %v3841_v55  ;;  %v1176_v8 = vcombine.low %v3624_v14, %v3851_v58 }
 0x1cc   : > { %868 = vrot.lane.b32.xlu0 %v3633_v16, %s3454_s17  ;;  %870 = vrot.lane.b32.xlu1 %v3642_v18, %s3454_s17  ;;  %v1432_v54 = vcombine.low %v3630_v15, %v3857_v59  ;;  %v1080_v11 = vcombine.low %v3645_v19, %v3867_v62  ;;  %v1464_v14 = vcombine.low %v3665_v24, %v3881_v2 }
 0x1cd   : > { %v1592_v15 = vcombine.low %v3668_v25, %v3883_v4  ;;  %v1720_v19 = vcombine.low %v3676_v27, %v3889_v6  ;;  %v1184_v58 = vcombine.low %v3969_v50, %v4097_v60  ;;  %v1312_v62 = vcombine.low %v3971_v0, %v4099_v42 }
 0x1ce   : > { %v4395_v40 = vpop.permute.xlu0 %700  ;;  %v4401_v37 = vpop.permute.xlu1 %702  ;;  %v1240_v0 = vcombine.low %v3699_v33, %v3905_v17  ;;  %v1144_v33 = vcombine.low %v3737_v43, %v3931_v38  ;;  %v1088_v17 = vcombine.low %v3995_v29, %v4123_v7  ;;  %v5449_v7 = vld [vmem:[#allocation63_spill] sm:$0xff]  ;;  %v5451_v29 = vld [vmem:[#allocation64_spill] sm:$0xff] }
 0x1cf   : > { %5442 = vst [vmem:[#allocation133_spill] sm:$0xff] %v4395_v40  ;;  %5443 = vst [vmem:[#allocation134_spill] sm:$0xff] %v4401_v37  ;;  %v4412_v40 = vsub.s32 %v1051_v39, %v3596_v3  ;;  %v1688_v39 = vcombine.low %v3618_v12, %v3849_v57  ;;  %v1056_v57 = vcombine.low %v3963_v9, %v4091_v47  ;;  %v5448_v47 = vld [vmem:[#allocation31_spill] sm:$0xff] }
 0x1d0   : > { %884 = vrot.lane.b32.xlu0 %v3679_v28, %s3454_s17  ;;  %886 = vrot.lane.b32.xlu1 %v3688_v30, %s3454_s17  ;;  %v1400_v50 = vcombine.low %v3748_v46, %v5448_v47  ;;  %v5453_v38 = vld [vmem:[#allocation67_spill] sm:$0xff]  ;;  %v5454_v46 = vld [vmem:[#allocation41_spill] sm:$0xff] }
 0x1d1   : > { %v4437_v55 = vrot.slane %v1048_v44, %v4412_v40  ;;  %v4448_v12 = vrot.slane %v1304_v5, %v4412_v40  ;;  %v4470_v25 = vrot.slane %v1688_v39, %v4412_v40  ;;  %v1183_v27 = vrot.slane %v1176_v8, %v4412_v40  ;;  %v5467_v47 = vld [vmem:[#allocation9_spill] sm:$0xff] }
 0x1d2   : > { %v4403_v61 = vpop.permute.xlu0 %712  ;;  %v4409_v53 = vpop.permute.xlu1 %714  ;;  %v4474_v59 = vrot.slane %v1432_v54, %v4412_v40  ;;  %v4494_v2 = vrot.slane %v1464_v14, %v4412_v40  ;;  %v4497_v4 = vrot.slane %v1592_v15, %v4412_v40  ;;  %v4500_v6 = vrot.slane %v1720_v19, %v4412_v40  ;;  %v5458_v15 = vld [vmem:[#allocation16_spill] sm:$0xff] }
 0x1d3   : > { %5444 = vst [vmem:[#allocation135_spill] sm:$0xff] %v4403_v61  ;;  %v1560_v61 = vcombine.low %v3607_v10, %v3843_v56  ;;  %v1208_v10 = vcombine.low %v3653_v21, %v3873_v63  ;;  %v1336_v56 = vcombine.low %v3656_v22, %v3875_v1  ;;  %v1112_v22 = vcombine.low %v3691_v31, %v3899_v13 }
 0x1d4   : > { %912 = vrot.lane.b32.xlu0 %v3760_v49, %s3454_s17  ;;  %914 = vrot.lane.b32.xlu1 %v3768_v51, %s3454_s17  ;;  %5446 = vst [vmem:[#allocation137_spill] sm:$0xff] %v4470_v25  ;;  %v4477_v31 = vrot.slane %v1080_v11, %v4412_v40  ;;  %v1440_v63 = vcombine.low %v3977_v35, %v4105_v52  ;;  %5447 = vst [vmem:[#allocation138_spill] sm:$0xff] %v4500_v6  ;;  %v5510_v25 = vld [vmem:[#allocation111_spill] sm:$0xff] }
 0x1d5   : > { %v4457_v21 = vrot.slane %v1560_v61, %v4412_v40  ;;  %v4480_v61 = vrot.slane %v1208_v10, %v4412_v40  ;;  %v4483_v60 = vrot.slane %v1336_v56, %v4412_v40  ;;  %v4505_v42 = vrot.slane %v1112_v22, %v4412_v40  ;;  %v5456_v10 = vld [vmem:[#allocation68_spill] sm:$0xff]  ;;  %v5457_v56 = vld [vmem:[#allocation42_spill] sm:$0xff] }
 0x1d6   : > { %v4416_v48 = vpop.permute.xlu0 %796  ;;  %v4426_v37 = vpop.permute.xlu1 %798  ;;  %v1368_v52 = vcombine.low %v3702_v34, %v3907_v20  ;;  %v1063_v9 = vrot.slane %v1056_v57, %v4412_v40  ;;  %v1191_v13 = vrot.slane %v1184_v58, %v4412_v40  ;;  %v1496_v44 = vcombine.low %v3711_v36, %v3913_v23  ;;  %v5450_v23 = vld [vmem:[#allocation37_spill] sm:$0xff] }
 0x1d7   : > { %5445 = vst [vmem:[#allocation136_spill] sm:$0xff] %v4457_v21  ;;  %v1216_v34 = vcombine.low %v4001_v26, %v4129_v32  ;;  %v1272_v20 = vcombine.low %v3745_v45, %v3937_v41  ;;  %v1319_v5 = vrot.slane %v1312_v62, %v4412_v40  ;;  %v1447_v39 = vrot.slane %v1440_v63, %v4412_v40  ;;  %v5452_v45 = vld [vmem:[#allocation38_spill] sm:$0xff]  ;;  %v5516_v21 = vld [vmem:[#allocation121_spill] sm:$0xff] }
 0x1d8   : > { %964 = vrot.lane.b32.xlu0 %v3633_v16, %s3455_s19  ;;  %966 = vrot.lane.b32.xlu1 %v3642_v18, %s3455_s19  ;;  %v4534_v43 = vrot.slane %v1240_v0, %v4412_v40  ;;  %v1568_v26 = vcombine.low %v5450_v23, %v5449_v7  ;;  %v1696_v32 = vcombine.low %v5452_v45, %v5451_v29  ;;  %v5470_v45 = vld [vmem:[#allocation73_spill] sm:$0xff]  ;;  %v5496_v16 = vld [vmem:[#allocation130_spill] sm:$0xff] }
 0x1d9   : > { %v1344_v41 = vcombine.low %v5454_v46, %v5453_v38  ;;  %v4543_v8 = vrot.slane %v1368_v52, %v4412_v40  ;;  %v2200_v54 = vcombine.low %v4437_v55, %v1063_v9  ;;  %v2217_v11 = vcombine.low %v1183_v27, %v1191_v13  ;;  %v5462_v9 = vld [vmem:[#allocation17_spill] sm:$0xff]  ;;  %v5472_v46 = vld [vmem:[#allocation74_spill] sm:$0xff] }
 0x1da   : > { %v4443_v3 = vpop.permute.xlu0 %808  ;;  %v4467_v24 = vpop.permute.xlu1 %810  ;;  %v1472_v14 = vcombine.low %v5457_v56, %v5456_v10  ;;  %v4553_v22 = vrot.slane %v1496_v44, %v4412_v40  ;;  %v4556_v57 = vrot.slane %v1144_v33, %v4412_v40  ;;  %v1095_v58 = vrot.slane %v1088_v17, %v4412_v40  ;;  %v5474_v56 = vld [vmem:[#allocation100_spill] sm:$0xff]  ;;  %v5477_v33 = vld [vmem:[#allocation103_spill] sm:$0xff] }
 0x1db   : > { %5455 = vst [vmem:[#allocation31_spill] sm:$0xff] %v4543_v8  ;;  %v1223_v62 = vrot.slane %v1216_v34, %v4412_v40  ;;  %v4561_v55 = vrot.slane %v1272_v20, %v4412_v40  ;;  %v4564_v27 = vrot.slane %v1400_v50, %v4412_v40  ;;  %v2234_v63 = vcombine.low %v4448_v12, %v1319_v5  ;;  %v5468_v5 = vld [vmem:[#allocation108_spill] sm:$0xff] }
 0x1dc   : > { %980 = vrot.lane.b32.xlu0 %v3679_v28, %s3455_s19  ;;  %982 = vrot.lane.b32.xlu1 %v3688_v30, %s3455_s19  ;;  %5459 = vst [vmem:[#allocation63_spill] sm:$0xff] %v4553_v22  ;;  %5460 = vst [vmem:[#allocation37_spill] sm:$0xff] %v4556_v57  ;;  %v2251_v0 = vcombine.low %v4474_v59, %v1447_v39  ;;  %v4575_v17 = vrot.slane %v1568_v26, %v4412_v40  ;;  %v5469_v39 = vld [vmem:[#allocation104_spill] sm:$0xff] }
 0x1dd   : > { %5461 = vst [vmem:[#allocation64_spill] sm:$0xff] %v4564_v27  ;;  %v4578_v34 = vrot.slane %v1696_v32, %v4412_v40  ;;  %v1351_v20 = vrot.slane %v1344_v41, %v4412_v40  ;;  %v4582_v12 = vrot.slane %v2200_v54, %v5467_v47  ;;  %v4585_v59 = vrot.slane %v2217_v11, %v5467_v47  ;;  %v5471_v32 = vld [vmem:[#allocation47_spill] sm:$0xff]  ;;  %v5473_v41 = vld [vmem:[#allocation48_spill] sm:$0xff] }
 0x1de   : > { %v4489_v1 = vpop.permute.xlu0 %892  ;;  %v4513_v35 = vpop.permute.xlu1 %894  ;;  %5465 = vst [vmem:[#allocation38_spill] sm:$0xff] %v4575_v17  ;;  %v1479_v50 = vrot.slane %v1472_v14, %v4412_v40  ;;  %v1200_v7 = vcombine.low %v5469_v39, %v5468_v5  ;;  %v2336_v26 = vcombine.low %v4477_v31, %v1095_v58  ;;  %v2353_v29 = vcombine.low %v4480_v61, %v1223_v62  ;;  %v5475_v14 = vld [vmem:[#allocation90_spill] sm:$0xff]  ;;  %v5476_v39 = vld [vmem:[#allocation107_spill] sm:$0xff]  ;;  %v5497_v27 = vld [vmem:[#allocation124_spill] sm:$0xff] }
 0x1df   : > { %5466 = vst [vmem:[#allocation67_spill] sm:$0xff] %v4578_v34  ;;  %v1120_v38 = vcombine.low %v5471_v32, %v5470_v45  ;;  %v1248_v54 = vcombine.low %v5473_v41, %v5472_v46  ;;  %v4601_v11 = vrot.slane %v2234_v63, %v5467_v47  ;;  %v4604_v10 = vrot.slane %v2251_v0, %v5467_v47  ;;  %v5478_v0 = vld [vmem:[#allocation69_spill] sm:$0xff]  ;;  %v5479_v45 = vld [vmem:[#allocation43_spill] sm:$0xff] }
 0x1e0   : > { %1008 = vrot.lane.b32.xlu0 %v3760_v49, %s3455_s19  ;;  %1010 = vrot.lane.b32.xlu1 %v3768_v51, %s3455_s19  ;;  %v1192_v5 = vcombine.low %v5475_v14, %v5474_v56  ;;  %v1072_v31 = vcombine.low %v5477_v33, %v5476_v39  ;;  %v2370_v63 = vcombine.low %v4483_v60, %v1351_v20  ;;  %v5480_v41 = vld [vmem:[#allocation99_spill] sm:$0xff]  ;;  %v5481_v33 = vld [vmem:[#allocation89_spill] sm:$0xff]  ;;  %v5482_v39 = vld [vmem:[#allocation110_spill] sm:$0xff] }
 0x1e1   : > { %v1600_v32 = vcombine.low %v5479_v45, %v5478_v0  ;;  %v2387_v46 = vcombine.low %v4494_v2, %v1479_v50  ;;  %v1064_v56 = vcombine.low %v5481_v33, %v5480_v41  ;;  %v1207_v14 = vrot.slane %v1200_v7, %v4412_v40  ;;  %v5483_v51 = vld [vmem:[#allocation106_spill] sm:$0xff]  ;;  %v5486_v33 = vld [vmem:[#allocation109_spill] sm:$0xff] }
 0x1e2   : > { %v4529_v36 = vpop.permute.xlu0 %904  ;;  %v4550_v19 = vpop.permute.xlu1 %906  ;;  %v1232_v49 = vcombine.low %v5483_v51, %v5482_v39  ;;  %v4632_v60 = vrot.slane %v2336_v26, %v5467_v47  ;;  %v4635_v20 = vrot.slane %v2353_v29, %v5467_v47  ;;  %v4638_v2 = vrot.slane %v1120_v38, %v4412_v40  ;;  %v5484_v51 = vld [vmem:[#allocation102_spill] sm:$0xff]  ;;  %v5487_v39 = vld [vmem:[#allocation105_spill] sm:$0xff] }
 0x1e3   : > { %v4641_v50 = vrot.slane %v1248_v54, %v4412_v40  ;;  %v1199_v7 = vrot.slane %v1192_v5, %v4412_v40  ;;  %v5485_v0 = vld [vmem:[#allocation98_spill] sm:$0xff]  ;;  %v1079_v41 = vrot.slane %v1072_v31, %v4412_v40  ;;  %v1104_v26 = vcombine.low %v5487_v39, %v5486_v33  ;;  %v5490_v5 = vld [vmem:[#allocation44_spill] sm:$0xff]  ;;  %v5509_v34 = vld [vmem:[#allocation117_spill] sm:$0xff] }
 0x1e4   : > { %708 = vrot.lane.b32.xlu0 %v5458_v15, %s3452_s7  ;;  %710 = vrot.lane.b32.xlu1 %v5462_v9, %s3452_s7  ;;  %v1224_v45 = vcombine.low %v5485_v0, %v5484_v51  ;;  %v4654_v29 = vrot.slane %v2370_v63, %v5467_v47  ;;  %v4657_v38 = vrot.slane %v1600_v32, %v4412_v40  ;;  %v5489_v54 = vld [vmem:[#allocation70_spill] sm:$0xff]  ;;  %v5491_v51 = vld [vmem:[#allocation101_spill] sm:$0xff] }
 0x1e5   : > { %v5492_v0 = vld [vmem:[#allocation97_spill] sm:$0xff]  ;;  %v4664_v28 = vrot.slane %v2387_v46, %v5467_v47  ;;  %v1071_v33 = vrot.slane %v1064_v56, %v4412_v40  ;;  %v2218_v39 = vcombine.low %v1199_v7, %v1207_v14  ;;  %v1239_v18 = vrot.slane %v1232_v49, %v4412_v40  ;;  %v5503_v46 = vld [vmem:[#allocation128_spill] sm:$0xff] }
 0x1e6   : > { %v4568_v52 = vpop.permute.xlu0 %988  ;;  %v4592_v23 = vpop.permute.xlu1 %990  ;;  %v1096_v31 = vcombine.low %v5492_v0, %v5491_v51  ;;  %v2472_v32 = vcombine.low %v4505_v42, %v4638_v2  ;;  %v2489_v30 = vcombine.low %v4534_v43, %v4641_v50  ;;  %v5494_v51 = vld [vmem:[#allocation75_spill] sm:$0xff]  ;;  %v5495_v0 = vld [vmem:[#allocation49_spill] sm:$0xff]  ;;  %v1488_v56 = vcombine.low %v5497_v27, %v5496_v16  ;;  %v5501_v42 = vld [vmem:[#allocation76_spill] sm:$0xff] }
 0x1e7   : > { %v1231_v14 = vrot.slane %v1224_v45, %v4412_v40  ;;  %v2201_v49 = vcombine.low %v1071_v33, %v1079_v41  ;;  %v1111_v7 = vrot.slane %v1104_v26, %v4412_v40  ;;  %v5502_v43 = vld [vmem:[#allocation50_spill] sm:$0xff]  ;;  %v5505_v45 = vld [vmem:[#allocation129_spill] sm:$0xff]  ;;  %v5506_v41 = vld [vmem:[#allocation123_spill] sm:$0xff]  ;;  %v2232_v26 = vrot.slane %v2218_v39, %v5467_v47 }
 0x1e8   : > { %804 = vrot.lane.b32.xlu0 %v5458_v15, %s3453_s8  ;;  %806 = vrot.lane.b32.xlu1 %v5462_v9, %s3453_s8  ;;  %v1504_v2 = vcombine.low %v5502_v43, %v5501_v42  ;;  %v1103_v50 = vrot.slane %v1096_v31, %v4412_v40  ;;  %v5504_v16 = vld [vmem:[#allocation122_spill] sm:$0xff]  ;;  %v1360_v33 = vcombine.low %v5506_v41, %v5505_v45  ;;  %v5511_v17 = vld [vmem:[#allocation21_spill] sm:$0xff]  ;;  %v5514_v43 = vld [vmem:[#allocation55_spill] sm:$0xff] }
 0x1e9   : > { %v1456_v27 = vcombine.low %v5504_v16, %v5503_v46  ;;  %v2354_v8 = vcombine.low %v1231_v14, %v1239_v18  ;;  %v5513_v31 = vld [vmem:[#allocation81_spill] sm:$0xff]  ;;  %v5515_v16 = vld [vmem:[#allocation127_spill] sm:$0xff]  ;;  %v1495_v39 = vrot.slane %v1488_v56, %v4412_v40  ;;  %v5517_v18 = vld [vmem:[#allocation132_spill] sm:$0xff] }
 0x1ea   : > { %v4610_v58 = vpop.permute.xlu0 %1000  ;;  %v4629_v61 = vpop.permute.xlu1 %1002  ;;  %v1152_v46 = vcombine.low %v5514_v43, %v5513_v31  ;;  %v1328_v45 = vcombine.low %v5516_v21, %v5515_v16  ;;  %v5518_v14 = vld [vmem:[#allocation126_spill] sm:$0xff]  ;;  %v5523_v43 = vld [vmem:[#allocation120_spill] sm:$0xff] }
 0x1eb   : > { %v1264_v41 = vcombine.low %v5518_v14, %v5517_v18  ;;  %v5522_v31 = vld [vmem:[#allocation22_spill] sm:$0xff]  ;;  %v1463_v56 = vrot.slane %v1456_v27, %v4412_v40  ;;  %v1367_v18 = vrot.slane %v1360_v33, %v4412_v40  ;;  %v5525_v14 = vld [vmem:[#allocation131_spill] sm:$0xff]  ;;  %v5528_v27 = vld [vmem:[#allocation113_spill] sm:$0xff] }
 0x1ec   : > { %900 = vrot.lane.b32.xlu0 %v5458_v15, %s3454_s17  ;;  %902 = vrot.lane.b32.xlu1 %v5462_v9, %s3454_s17  ;;  %v5524_v21 = vld [vmem:[#allocation114_spill] sm:$0xff]  ;;  %v1335_v33 = vrot.slane %v1328_v45, %v4412_v40 }
 0x1ed   : > { %v1256_v16 = vcombine.low %v5524_v21, %v5523_v43  ;;  %v5527_v43 = vld [vmem:[#allocation119_spill] sm:$0xff] }
 0x1ee   : > { %v4649_v62 = vpop.permute.xlu0 %688  ;;  %v4670_v63 = vpop.permute.xlu1 %690  ;;  %v1128_v21 = vcombine.low %v5528_v27, %v5527_v43  ;;  %v1520_v27 = vcombine.low %v4513_v35, %v4592_v23  ;;  %v5532_v35 = vld [vmem:[#allocation135_spill] sm:$0xff] }
 0x1ef   : > { %5488 = vst [vmem:[#allocation41_spill] sm:$0xff] %v4649_v62  ;;  %5493 = vst [vmem:[#allocation68_spill] sm:$0xff] %v4670_v63  ;;  %v5499_v62 = vld [vmem:[#allocation112_spill] sm:$0xff]  ;;  %v1263_v43 = vrot.slane %v1256_v16, %v4412_v40  ;;  %v1160_v23 = vcombine.low %v5532_v35, %v4443_v3  ;;  %v5545_v35 = vld [vmem:[#allocation67_spill] sm:$0xff] }
 0x1f0   : > { %996 = vrot.lane.b32.xlu0 %v5458_v15, %s3455_s19  ;;  %v5498_v15 = vld [vmem:[#allocation118_spill] sm:$0xff]  ;;  %998 = vrot.lane.b32.xlu1 %v5462_v9, %s3455_s19  ;;  %v1352_v9 = vcombine.low %v5510_v25, %v5509_v34  ;;  %v5519_v25 = vld [vmem:[#allocation115_spill] sm:$0xff]  ;;  %v1135_v16 = vrot.slane %v1128_v21, %v4412_v40 }
 0x1f1   : > { %v1480_v63 = vcombine.low %v5499_v62, %v5498_v15  ;;  %v5507_v15 = vld [vmem:[#allocation116_spill] sm:$0xff]  ;;  %v5520_v34 = vld [vmem:[#allocation91_spill] sm:$0xff] }
 0x1f2   : > { %v4684_v6 = vpop.permute.xlu0 %716  ;;  %v5508_v62 = vld [vmem:[#allocation92_spill] sm:$0xff]  ;;  %v4702_v42 = vpop.permute.xlu1 %718  ;;  %v1320_v13 = vcombine.low %v5520_v34, %v5519_v25  ;;  %v2368_v25 = vrot.slane %v2354_v8, %v5467_v47  ;;  %v1359_v34 = vrot.slane %v1352_v9, %v4412_v40 }
 0x1f3   : > { %5500 = vst [vmem:[#allocation42_spill] sm:$0xff] %v4684_v6  ;;  %v1448_v6 = vcombine.low %v5508_v62, %v5507_v15  ;;  %5512 = vst [vmem:[#allocation9_spill] sm:$0xff] %v4702_v42  ;;  %v2215_v15 = vrot.slane %v2201_v49, %v5467_v47  ;;  %v2337_v62 = vcombine.low %v1103_v50, %v1111_v7  ;;  %v5526_v49 = vld [vmem:[#allocation125_spill] sm:$0xff] }
 0x1f4   : > { %724 = vrot.lane.b32.xlu0 %v5511_v17, %s3452_s7  ;;  %v1487_v44 = vrot.slane %v1480_v63, %v4412_v40  ;;  %726 = vrot.lane.b32.xlu1 %v5522_v31, %s3452_s7  ;;  %v1136_v7 = vcombine.low %v5526_v49, %v5525_v14  ;;  %v2233_v50 = vcombine.low %v4585_v59, %v2232_v26  ;;  %v5529_v59 = vld [vmem:[#allocation82_spill] sm:$0xff]  ;;  %v5530_v26 = vld [vmem:[#allocation56_spill] sm:$0xff]  ;;  %s3381_s7 = sshll.u32 %s3460_s6, 4  ;;  %s3382_s7 = int_to_ptr.vmem [resolvable:$false] %s3381_s7 }
 0x1f5   : > { %v1455_v63 = vrot.slane %v1448_v6, %v4412_v40  ;;  %v1271_v14 = vrot.slane %v1264_v41, %v4412_v40  ;;  %v1280_v8 = vcombine.low %v5530_v26, %v5529_v59  ;;  %v2216_v6 = vcombine.low %v4582_v12, %v2215_v15  ;;  %p3384_p8 = scmp.lt.s32.totalorder %s5231_s9, %s3382_s7 }
 0x1f6   : > { %v4715_v42 = vpop.permute.xlu0 %768  ;;  %v2388_v57 = vcombine.low %v1487_v44, %v1495_v39  ;;  %v2351_v9 = vrot.slane %v2337_v62, %v5467_v47  ;;  %v1327_v49 = vrot.slane %v1320_v13, %v4412_v40  ;;  %v2371_v44 = vcombine.low %v1359_v34, %v1367_v18 }
 0x1f7   : > { %5521 = vst [vmem:[#allocation108_spill] sm:$0xff] %v4715_v42  ;;  %v4731_v42 = vpop.permute.xlu1 %770  ;;  %v2252_v45 = vcombine.low %v1455_v63, %v1463_v56  ;;  %v1143_v39 = vrot.slane %v1136_v7, %v4412_v40  ;;  %v4749_v41 = vrot.slane %v2472_v32, %v5467_v47  ;;  %v4752_v12 = vrot.slane %v2489_v30, %v5467_v47 }
 0x1f8   : > { %820 = vrot.lane.b32.xlu0 %v5511_v17, %s3453_s8  ;;  %822 = vrot.lane.b32.xlu1 %v5522_v31, %s3453_s8  ;;  %v2369_v15 = vcombine.low %v4635_v20, %v2368_v25  ;;  %v2776_v62 = vpack.c.bf16 %v2233_v50, %v2216_v6  ;;  %v2235_v56 = vcombine.low %v1327_v49, %v1335_v33  ;;  %s3383_s8 = scalar_lea.vmem %s3382_s7, 256 }
 0x1f9   : > { %v2402_v18 = vrot.slane %v2388_v57, %v5467_v47  ;;  %v2490_v7 = vcombine.low %v1263_v43, %v1271_v14  ;;  %v4762_v32 = vrot.slane %v1504_v2, %v4412_v40  ;;  %v4765_v30 = vrot.slane %v1152_v46, %v4412_v40  ;;  %p3385_p10 = scmp.lt.s32.totalorder %s3383_s8, %s3377_s4 }
 0x1fa   : > { %v4742_v22 = vpop.permute.xlu0 %784  ;;  %v4768_v20 = vrot.slane %v1280_v8, %v4412_v40  ;;  %v1296_v25 = vcombine.low %v4550_v19, %v4629_v61  ;;  %v2352_v57 = vcombine.low %v4632_v60, %v2351_v9  ;;  %v2266_v50 = vrot.slane %v2252_v45, %v5467_v47  ;;  %v5533_v9 = vld [vmem:[#allocation133_spill] sm:$0xff] }
 0x1fb   : > { %v4757_v13 = vpop.permute.xlu1 %786  ;;  %v2385_v2 = vrot.slane %v2371_v44, %v5467_v47  ;;  %v2473_v34 = vcombine.low %v1135_v16, %v1143_v39  ;;  %v1288_v46 = vcombine.low %v4409_v53, %v4467_v24  ;;  %v1168_v19 = vcombine.low %v4529_v36, %v4610_v58  ;;  %v5531_v53 = vld [vmem:[#allocation134_spill] sm:$0xff]  ;;  %p3386_p0 = por %p3385_p10, %p3384_p8 }
 0x1fc   : > { %916 = vrot.lane.b32.xlu0 %v5511_v17, %s3454_s17  ;;  %918 = vrot.lane.b32.xlu1 %v5522_v31, %s3454_s17  ;;  %v2813_v60 = vunpack.c.l.b16 %v2776_v62  ;;  %v2249_v21 = vrot.slane %v2235_v56, %v5467_v47  ;;  %v2403_v33 = vcombine.low %v4664_v28, %v2402_v18  ;;  %v2504_v14 = vrot.slane %v2490_v7, %v5467_v47 }
 0x1fd   : > { %v2780_v59 = vpack.c.bf16 %v2369_v15, %v2352_v57  ;;  %v1512_v24 = vcombine.low %v5531_v53, %v4426_v37  ;;  %v1392_v36 = vcombine.low %v4489_v1, %v4568_v52  ;;  %v1303_v58 = vrot.slane %v1296_v25, %v4412_v40  ;;  %p3387_p2 = pnand %p3386_p0, %p3380_p13 }
 0x1fe   : > { %v4772_v63 = vpop.permute.xlu0 %812  ;;  %v2267_v28 = vcombine.low %v4604_v10, %v2266_v50  ;;  %v2386_v8 = vcombine.low %v4654_v29, %v2385_v2  ;;  %v2487_v6 = vrot.slane %v2473_v34, %v5467_v47  ;;  %v2814_v37 = vunpack.c.h.b16 %v2776_v62 }
 0x1ff   : > { %v4787_v61 = vpop.permute.xlu1 %814  ;;  %v1384_v3 = vcombine.low %v5533_v9, %v4416_v48  ;;  %v1295_v49 = vrot.slane %v1288_v46, %v4412_v40  ;;  %v1527_v1 = vrot.slane %v1520_v27, %v4412_v40  ;;  %v1175_v52 = vrot.slane %v1168_v19, %v4412_v40 }
 0x200   : > { %1012 = vrot.lane.b32.xlu0 %v5511_v17, %s3455_s19  ;;  %1014 = vrot.lane.b32.xlu1 %v5522_v31, %s3455_s19  ;;  %v2250_v45 = vcombine.low %v4601_v11, %v2249_v21  ;;  %v2505_v10 = vcombine.low %v4752_v12, %v2504_v14  ;;  %v2822_v29 = vunpack.c.h.b16 %v2780_v59  ;;  %v4815_v44 = vpack.c.bf16 %v2403_v33, %v2386_v8  ;;  %v5538_v33 = vld [vmem:[#allocation18_spill] sm:$0xff] }
 0x201   : > { %v1519_v39 = vrot.slane %v1512_v24, %v4412_v40  ;;  %v1167_v48 = vrot.slane %v1160_v23, %v4412_v40  ;;  %v1399_v15 = vrot.slane %v1392_v36, %v4412_v40  ;;  %v2626_v62 = vcombine.low %v1295_v49, %v1303_v58  ;;  %v5544_v24 = vld [vmem:[#allocation137_spill] sm:$0xff]  ;;  %v5547_v58 = vld [vmem:[#allocation31_spill] sm:$0xff] }
 0x202   : > { %v4799_v26 = vpop.permute.xlu0 %864  ;;  %v5534_v56 = vcombine.low %v5495_v0, %v5494_v51  ;;  %v2625_v12 = vcombine.low %v4561_v55, %v4768_v20  ;;  %v2821_v18 = vunpack.c.l.b16 %v2780_v59  ;;  %v4828_v7 = vpack.c.bf16 %v2267_v28, %v2250_v45  ;;  %v5536_v0 = vld [vmem:[#allocation63_spill] sm:$0xff]  ;;  %v5542_v59 = vld [vmem:[#allocation38_spill] sm:$0xff] }
 0x203   : > { %v4811_v43 = vpop.permute.xlu1 %866  ;;  %v2488_v25 = vcombine.low %v4749_v41, %v2487_v6  ;;  %v1391_v57 = vrot.slane %v1384_v3, %v4412_v40  ;;  %v2524_v50 = vcombine.low %v1519_v39, %v1527_v1  ;;  %v2609_v2 = vcombine.low %v1167_v48, %v1175_v52  ;;  %v5537_v41 = vld [vmem:[#allocation37_spill] sm:$0xff]  ;;  %v5548_v1 = vld [vmem:[#allocation138_spill] sm:$0xff] }
 0x204   : > { %2846 = vperm.xlu0 %3337, %v2813_v60   ;;  %2849 = vperm.xlu1 %3338, %v2814_v37   ;;  %v1383_v11 = vrot.slane %v5534_v56, %v4412_v40  ;;  %v2404_v46 = vcombine.low %v4497_v4, %v4657_v38  ;;  %v5535_v51 = vcombine.low %v5490_v5, %v5489_v54  ;;  %v2823_v4 = vunpack.c.l.b16 %v4815_v44  ;;  %v5539_v54 = vld [vmem:[#allocation32_spill] sm:$0xff] }
 0x205   : > { %v2523_v20 = vcombine.low %v5536_v0, %v4762_v32  ;;  %v2608_v27 = vcombine.low %v5537_v41, %v4765_v30  ;;  %v2507_v19 = vcombine.low %v1391_v57, %v1399_v15  ;;  %v2640_v60 = vrot.slane %v2626_v62, %v5467_v47  ;;  %v5541_v32 = vld [vmem:[#allocation136_spill] sm:$0xff]  ;;  %v5554_v0 = vld [vmem:[#allocation41_spill] sm:$0xff] }
 0x206   : > { %v4820_v16 = vpop.permute.xlu0 %880  ;;  %v4840_v55 = vrot.slane %v5535_v51, %v4412_v40  ;;  %v2784_v38 = vpack.c.bf16 %v2505_v10, %v2488_v25  ;;  %v5540_v5 = vcombine.low %v5538_v33, %v5539_v54  ;;  %v5543_v53 = vcombine.low %v5541_v32, %v5542_v59  ;;  %v5549_v10 = vld [vmem:[#allocation108_spill] sm:$0xff]  ;;  %v5552_v25 = vld [vmem:[#allocation57_spill] sm:$0xff] }
 0x207   : > { %v4832_v34 = vpop.permute.xlu1 %882  ;;  %v5546_v23 = vcombine.low %v5544_v24, %v5545_v35  ;;  %v2506_v28 = vcombine.low %v5547_v58, %v1383_v11  ;;  %v2633_v8 = vrot.slane %v2625_v12, %v5467_v47  ;;  %v2538_v6 = vrot.slane %v2524_v50, %v5467_v47  ;;  %v5553_v50 = vld [vmem:[#allocation94_spill] sm:$0xff] }
 0x208   : > { %2873 = vperm.xlu0 %3337, %v2822_v29   ;;  %2870 = vperm.xlu1 %3338, %v2821_v18   ;;  %v4854_v14 = vrot.slane %v5540_v5, %v4412_v40  ;;  %v4860_v30 = vrot.slane %v5543_v53, %v5467_v47  ;;  %v2623_v37 = vrot.slane %v2609_v2, %v5467_v47  ;;  %v2815_v3 = vunpack.c.l.b16 %v4828_v7  ;;  %v5550_v29 = vld [vmem:[#allocation93_spill] sm:$0xff]  ;;  %v5551_v18 = vld [vmem:[#allocation83_spill] sm:$0xff] }
 0x209   : > { %v4866_v36 = vrot.slane %v5546_v23, %v5467_v47  ;;  %v4876_v49 = vrot.slane %v2404_v46, %v5467_v47  ;;  %v2421_v52 = vcombine.low %v5548_v1, %v4840_v55  ;;  %v2531_v45 = vrot.slane %v2523_v20, %v5467_v47 }
 0x20a   : > { %v4847_v21 = vpop.permute.xlu0 %908  ;;  %v1576_v39 = vcombine.low %v5550_v29, %v5549_v10  ;;  %v2616_v48 = vrot.slane %v2608_v27, %v5467_v47  ;;  %v2521_v15 = vrot.slane %v2507_v19, %v5467_v47  ;;  %v2641_v62 = vcombine.low %v2633_v8, %v2640_v60  ;;  %v5555_v19 = vld [vmem:[#allocation84_spill] sm:$0xff]  ;;  %v5556_v60 = vld [vmem:[#allocation58_spill] sm:$0xff] }
 0x20b   : > { %v4872_v9 = vpop.permute.xlu1 %910  ;;  %v2830_v11 = vunpack.c.h.b16 %v2784_v38  ;;  %v2514_v12 = vrot.slane %v2506_v28, %v5467_v47  ;;  %v1408_v57 = vcombine.low %v5552_v25, %v5551_v18  ;;  %v1704_v2 = vcombine.low %v5553_v50, %v4731_v42 }
 0x20c   : > { %2876 = vperm.xlu0 %3337, %v2823_v4   ;;  %2852 = vperm.xlu1 %3338, %v2815_v3   ;;  %v2539_v51 = vcombine.low %v2531_v45, %v2538_v6  ;;  %v2624_v55 = vcombine.low %v2616_v48, %v2623_v37  ;;  %v1608_v20 = vcombine.low %v5554_v0, %v4742_v22  ;;  %v2829_v27 = vunpack.c.l.b16 %v2784_v38  ;;  %v5558_v45 = vld [vmem:[#allocation42_spill] sm:$0xff] }
 0x20d   : > { %v1536_v4 = vcombine.low %v5556_v60, %v5555_v19  ;;  %v1583_v33 = vrot.slane %v1576_v39, %v4412_v40  ;;  %v2522_v42 = vcombine.low %v2514_v12, %v2521_v15  ;;  %v2824_v22 = vunpack.c.h.b16 %v4815_v44 }
 0x20e   : > { %v961_v56 = vpop.permute.xlu0 %960  ;;  %v2788_v53 = vpack.c.bf16 %v2641_v62, %v2624_v55  ;;  %v1711_v38 = vrot.slane %v1704_v2, %v4412_v40  ;;  %v1415_v58 = vrot.slane %v1408_v57, %v4412_v40  ;;  %v1416_v10 = vcombine.low %v5558_v45, %v4772_v63  ;;  %v5560_v2 = vld [vmem:[#allocation64_spill] sm:$0xff] }
 0x20f   : > { %v1584_v46 = vcombine.low %v4799_v26, %v961_v56  ;;  %v963_v41 = vpop.permute.xlu1 %962  ;;  %v5557_v26 = vld [vmem:[#allocation68_spill] sm:$0xff]  ;;  %v2785_v8 = vpack.c.bf16 %v2539_v51, %v2522_v42  ;;  %v1543_v1 = vrot.slane %v1536_v4, %v4412_v40 }
 0x210   : > { %2897 = vperm.xlu0 %3337, %v2830_v11   ;;  %v1712_v5 = vcombine.low %v4811_v43, %v963_v41  ;;  %v1736_v32 = vcombine.low %v5557_v26, %v4757_v13  ;;  %2894 = vperm.xlu1 %3338, %v2829_v27   ;;  %v1615_v43 = vrot.slane %v1608_v20, %v4412_v40  ;;  %v2816_v13 = vunpack.c.h.b16 %v4828_v7  ;;  %v5559_v7 = vld [vmem:[#allocation9_spill] sm:$0xff] }
 0x211   : > { %v1591_v54 = vrot.slane %v1584_v46, %v4412_v40  ;;  %v2837_v39 = vunpack.c.l.b16 %v2788_v53  ;;  %v1544_v48 = vcombine.low %v5559_v7, %v4787_v61  ;;  %v2831_v63 = vunpack.c.l.b16 %v2785_v8 }
 0x212   : > { %v977_v59 = vpop.permute.xlu0 %976  ;;  %v1719_v35 = vrot.slane %v1712_v5, %v4412_v40  ;;  %v2642_v46 = vcombine.low %v5560_v2, %v1415_v58  ;;  %v2659_v51 = vcombine.low %v4854_v14, %v1543_v1  ;;  %v5567_v1 = vld [vmem:[#allocation28_spill] sm:$0xff] }
 0x213   : > { %v2269_v24 = vcombine.low %v1583_v33, %v1591_v54  ;;  %v1616_v23 = vcombine.low %v4820_v16, %v977_v59  ;;  %v979_v28 = vpop.permute.xlu1 %978  ;;  %v1743_v16 = vrot.slane %v1736_v32, %v4412_v40 }
 0x214   : > { %2879 = vperm.xlu0 %3337, %v2824_v22   ;;  %v2286_v44 = vcombine.low %v1711_v38, %v1719_v35  ;;  %v1744_v3 = vcombine.low %v4832_v34, %v979_v28  ;;  %2855 = vperm.xlu1 %3338, %v2816_v13   ;;  %v2429_v34 = vrot.slane %v2421_v52, %v5467_v47  ;;  %v2832_v38 = vunpack.c.h.b16 %v2785_v8  ;;  %v5562_v35 = vld [vmem:[#allocation51_spill] sm:$0xff]  ;;  %v5564_v28 = vld [vmem:[#allocation52_spill] sm:$0xff] }
 0x215   : > { %v2283_v6 = vrot.slane %v2269_v24, %v5467_v47  ;;  %v1623_v37 = vrot.slane %v1616_v23, %v4412_v40  ;;  %v1423_v52 = vrot.slane %v1416_v10, %v4412_v40  ;;  %v2650_v5 = vrot.slane %v2642_v46, %v5467_v47  ;;  %v5561_v24 = vld [vmem:[#allocation77_spill] sm:$0xff] }
 0x216   : > { %v1005_v29 = vpop.permute.xlu0 %1004  ;;  %v2300_v15 = vrot.slane %v2286_v44, %v5467_v47  ;;  %v1751_v56 = vrot.slane %v1744_v3, %v4412_v40  ;;  %v2667_v42 = vrot.slane %v2659_v51, %v5467_v47  ;;  %v1632_v23 = vcombine.low %v5562_v35, %v5561_v24  ;;  %v5565_v44 = vld [vmem:[#allocation27_spill] sm:$0xff] }
 0x217   : > { %v2405_v62 = vcombine.low %v1615_v43, %v1623_v37  ;;  %v2284_v11 = vcombine.low %v4860_v30, %v2283_v6  ;;  %v1424_v12 = vcombine.low %v4847_v21, %v1005_v29  ;;  %v1007_v18 = vpop.permute.xlu1 %1006  ;;  %v1551_v21 = vrot.slane %v1544_v48, %v4412_v40  ;;  %v5563_v43 = vld [vmem:[#allocation78_spill] sm:$0xff]  ;;  %v5571_v35 = vld [vmem:[#allocation23_spill] sm:$0xff] }
 0x218   : > { %2918 = vperm.xlu0 %3337, %v2837_v39   ;;  %v2301_v25 = vcombine.low %v4866_v36, %v2300_v15  ;;  %v2422_v50 = vcombine.low %v1743_v16, %v1751_v56  ;;  %v1552_v61 = vcombine.low %v4872_v9, %v1007_v18  ;;  %2900 = vperm.xlu1 %3338, %v2831_v63   ;;  %v2838_v9 = vunpack.c.h.b16 %v2788_v53  ;;  %v5566_v37 = vld [vmem:[#allocation14_spill] sm:$0xff]  ;;  %v5568_v16 = vld [vmem:[#allocation15_spill] sm:$0xff] }
 0x219   : > { %v2419_v57 = vrot.slane %v2405_v62, %v5467_v47  ;;  %v1431_v30 = vrot.slane %v1424_v12, %v4412_v40  ;;  %v1760_v13 = vcombine.low %v5564_v28, %v5563_v43  ;;  %v1624_v3 = vcombine.low %v5566_v37, %v5565_v44  ;;  %v5573_v43 = vld [vmem:[#allocation66_spill] sm:$0xff]  ;;  %v5574_v28 = vld [vmem:[#allocation40_spill] sm:$0xff]  ;;  %v5576_v37 = vld [vmem:[#allocation11_spill] sm:$0xff] }
 0x21a   : > { %v705_v55 = vpop.permute.xlu0 %704  ;;  %v2436_v0 = vrot.slane %v2422_v50, %v5467_v47  ;;  %v1559_v36 = vrot.slane %v1552_v61, %v4412_v40  ;;  %v2778_v20 = vpack.c.bf16 %v2301_v25, %v2284_v11  ;;  %v1752_v45 = vcombine.low %v5568_v16, %v5567_v1  ;;  %v5575_v44 = vld [vmem:[#allocation24_spill] sm:$0xff]  ;;  %v5577_v1 = vld [vmem:[#allocation25_spill] sm:$0xff] }
 0x21b   : > { %v2643_v41 = vcombine.low %v1423_v52, %v1431_v30  ;;  %v707_v27 = vpop.permute.xlu1 %706  ;;  %v2420_v19 = vcombine.low %v4876_v49, %v2419_v57  ;;  %v1639_v7 = vrot.slane %v1632_v23, %v4412_v40  ;;  %v1767_v15 = vrot.slane %v1760_v13, %v4412_v40  ;;  %v5572_v23 = vld [vmem:[#allocation10_spill] sm:$0xff]  ;;  %v5578_v16 = vld [vmem:[#allocation12_spill] sm:$0xff] }
 0x21c   : > { %v2437_v60 = vcombine.low %v2429_v34, %v2436_v0  ;;  %v2660_v14 = vcombine.low %v1551_v21, %v1559_v36  ;;  %v2817_v4 = vunpack.c.l.b16 %v2778_v20  ;;  %2921 = vperm.xlu1 %3338, %v2838_v9   ;;  %v2818_v8 = vunpack.c.h.b16 %v2778_v20 }
 0x21d   : > { %v2657_v33 = vrot.slane %v2643_v41, %v5467_v47  ;;  %v1631_v34 = vrot.slane %v1624_v3, %v4412_v40  ;;  %v1759_v11 = vrot.slane %v1752_v45, %v4412_v40  ;;  %v1952_v13 = vcombine.low %v5574_v28, %v5573_v43 }
 0x21e   : > { %v801_v54 = vpop.permute.xlu0 %800  ;;  %v2674_v26 = vrot.slane %v2660_v14, %v5467_v47  ;;  %2858 = vperm.xlu0 %3337, %v2817_v4   ;;  %v2782_v32 = vpack.c.bf16 %v2437_v60, %v2420_v19  ;;  %v1944_v3 = vcombine.low %v5576_v37, %v5575_v44  ;;  %v1848_v45 = vcombine.low %v5578_v16, %v5577_v1  ;;  %v5591_v37 = vld [vmem:[#allocation85_spill] sm:$0xff]  ;;  %v5594_v1 = vld [vmem:[#allocation60_spill] sm:$0xff] }
 0x21f   : > { %v803_v59 = vpop.permute.xlu1 %802  ;;  %v2658_v22 = vcombine.low %v2650_v5, %v2657_v33  ;;  %v1640_v29 = vcombine.low %v705_v55, %v801_v54  ;;  %v2540_v50 = vcombine.low %v1631_v34, %v1639_v7  ;;  %v2557_v2 = vcombine.low %v1759_v11, %v1767_v15  ;;  %v5582_v15 = vld [vmem:[#allocation19_spill] sm:$0xff] }
 0x220   : > { %v2675_v53 = vcombine.low %v2667_v42, %v2674_v26  ;;  %v2825_v49 = vunpack.c.l.b16 %v2782_v32  ;;  %v1768_v62 = vcombine.low %v707_v27, %v803_v59  ;;  %v2826_v57 = vunpack.c.h.b16 %v2782_v32  ;;  %v5583_v11 = vld [vmem:[#allocation71_spill] sm:$0xff] }
 0x221   : > { %v1647_v18 = vrot.slane %v1640_v29, %v4412_v40  ;;  %v2548_v20 = vrot.slane %v2540_v50, %v5467_v47  ;;  %v2565_v41 = vrot.slane %v2557_v2, %v5467_v47  ;;  %v1959_v34 = vrot.slane %v1952_v13, %v4412_v40  ;;  %v5587_v2 = vld [vmem:[#allocation34_spill] sm:$0xff] }
 0x222   : > { %v897_v58 = vpop.permute.xlu0 %896  ;;  %2903 = vperm.xlu0 %3337, %v2832_v38   ;;  %2882 = vperm.xlu1 %3338, %v2825_v49   ;;  %v2789_v6 = vpack.c.bf16 %v2675_v53, %v2658_v22  ;;  %v1775_v46 = vrot.slane %v1768_v62, %v4412_v40  ;;  %v5569_v53 = vld [vmem:[#allocation65_spill] sm:$0xff]  ;;  %v5570_v38 = vld [vmem:[#allocation39_spill] sm:$0xff] }
 0x223   : > { %v899_v10 = vpop.permute.xlu1 %898  ;;  %v1824_v49 = vcombine.low %v5570_v38, %v5569_v53 }
 0x224   : > { %v2839_v39 = vunpack.c.l.b16 %v2789_v6  ;;  %v2840_v0 = vunpack.c.h.b16 %v2789_v6 }
 0x226   : > { %v993_v48 = vpop.permute.xlu0 %992  ;;  %2861 = vperm.xlu0 %3337, %v2818_v8   ;;  %2924 = vperm.xlu1 %3338, %v2839_v39   ;;  %v5579_v8 = vld [vmem:[#allocation26_spill] sm:$0xff]  ;;  %v5580_v39 = vld [vmem:[#allocation13_spill] sm:$0xff] }
 0x227   : > { %v1648_v56 = vcombine.low %v897_v58, %v993_v48  ;;  %v995_v12 = vpop.permute.xlu1 %994  ;;  %v1816_v58 = vcombine.low %v5572_v23, %v5571_v35  ;;  %v1976_v7 = vcombine.low %v5580_v39, %v5579_v8  ;;  %v5581_v48 = vld [vmem:[#allocation33_spill] sm:$0xff] }
 0x228   : > { %v1776_v25 = vcombine.low %v899_v10, %v995_v12  ;;  %v1831_v10 = vrot.slane %v1824_v49, %v4412_v40  ;;  %v1656_v62 = vcombine.low %v5582_v15, %v5581_v48  ;;  %v5584_v12 = vld [vmem:[#allocation45_spill] sm:$0xff] }
 0x229   : > { %v1655_v63 = vrot.slane %v1648_v56, %v4412_v40  ;;  %v1823_v56 = vrot.slane %v1816_v58, %v4412_v40 }
 0x22a   : > { %v4950_v61 = vpop.permute.xlu0 %692  ;;  %v1783_v52 = vrot.slane %v1776_v25, %v4412_v40  ;;  %2885 = vperm.xlu1 %3338, %v2826_v57   ;;  %v5586_v25 = vld [vmem:[#allocation46_spill] sm:$0xff] }
 0x22b   : > { %v2541_v51 = vcombine.low %v1647_v18, %v1655_v63  ;;  %v4954_v30 = vpop.permute.xlu1 %694  ;;  %v1856_v18 = vcombine.low %v5584_v12, %v5583_v11  ;;  %v5585_v63 = vld [vmem:[#allocation72_spill] sm:$0xff] }
 0x22c   : > { %v2558_v21 = vcombine.low %v1775_v46, %v1783_v52  ;;  %v1984_v57 = vcombine.low %v5586_v25, %v5585_v63  ;;  %v5588_v46 = vld [vmem:[#allocation20_spill] sm:$0xff]  ;;  %v5589_v52 = vld [vmem:[#allocation95_spill] sm:$0xff] }
 0x22d   : > { %v2555_v55 = vrot.slane %v2541_v51, %v5467_v47  ;;  %v1784_v51 = vcombine.low %v5588_v46, %v5587_v2  ;;  %v1863_v49 = vrot.slane %v1856_v18, %v4412_v40 }
 0x22e   : > { %v4957_v36 = vpop.permute.xlu0 %720  ;;  %v2572_v27 = vrot.slane %v2558_v21, %v5467_v47  ;;  %2927 = vperm.xlu1 %3338, %v2840_v0   ;;  %v1951_v21 = vrot.slane %v1944_v3, %v4412_v40  ;;  %v1855_v0 = vrot.slane %v1848_v45, %v4412_v40  ;;  %v1991_v35 = vrot.slane %v1984_v57, %v4412_v40  ;;  %v5593_v3 = vld [vmem:[#allocation86_spill] sm:$0xff] }
 0x22f   : > { %v4962_v9 = vpop.permute.xlu1 %722  ;;  %v2556_v19 = vcombine.low %v2548_v20, %v2555_v55  ;;  %v2302_v20 = vcombine.low %v1823_v56, %v1831_v10  ;;  %v1791_v58 = vrot.slane %v1784_v51, %v4412_v40  ;;  %v1792_v16 = vcombine.low %v5594_v1, %v5593_v3 }
 0x230   : > { %v2573_v60 = vcombine.low %v2565_v41, %v2572_v27  ;;  %v1983_v27 = vrot.slane %v1976_v7, %v4412_v40  ;;  %v2319_v38 = vcombine.low %v1951_v21, %v1959_v34 }
 0x231   : > { %v2310_v44 = vrot.slane %v2302_v20, %v5467_v47  ;;  %v1799_v12 = vrot.slane %v1792_v16, %v4412_v40 }
 0x232   : > { %v773_v14 = vpop.permute.xlu0 %772  ;;  %v4964_v4 = vpack.c.bf16 %v2573_v60, %v2556_v19  ;;  %v5003_v19 = vrot.slane %v1656_v62, %v4412_v40  ;;  %v5590_v60 = vld [vmem:[#allocation96_spill] sm:$0xff]  ;;  %v2327_v7 = vrot.slane %v2319_v38, %v5467_v47  ;;  %v2455_v48 = vcombine.low %v1983_v27, %v1991_v35 }
 0x233   : > { %v775_v33 = vpop.permute.xlu1 %774  ;;  %v1832_v55 = vcombine.low %v5589_v52, %v773_v14 }
 0x234   : > { %v2833_v54 = vunpack.c.l.b16 %v4964_v4  ;;  %v2463_v51 = vrot.slane %v2455_v48, %v5467_v47  ;;  %v2834_v1 = vunpack.c.h.b16 %v4964_v4  ;;  %v5599_v48 = vld [vmem:[#allocation29_spill] sm:$0xff] }
 0x235   : > { %v1839_v43 = vrot.slane %v1832_v55, %v4412_v40 }
 0x236   : > { %v789_v5 = vpop.permute.xlu0 %788  ;;  %2906 = vperm.xlu0 %3337, %v2833_v54   ;;  %v1960_v54 = vcombine.low %v5590_v60, %v775_v33  ;;  %v5592_v33 = vld [vmem:[#allocation59_spill] sm:$0xff] }
 0x237   : > { %v791_v42 = vpop.permute.xlu1 %790  ;;  %v1864_v14 = vcombine.low %v4950_v61, %v789_v5 }
 0x238   : > { %v1992_v45 = vcombine.low %v4954_v30, %v791_v42  ;;  %v1967_v61 = vrot.slane %v1960_v54, %v4412_v40 }
 0x239   : > { %v1871_v15 = vrot.slane %v1864_v14, %v4412_v40 }
 0x23a   : > { %v4967_v26 = vpop.permute.xlu0 %816  ;;  %v1999_v18 = vrot.slane %v1992_v45, %v4412_v40  ;;  %v5595_v45 = vld [vmem:[#allocation79_spill] sm:$0xff] }
 0x23b   : > { %v4969_v32 = vpop.permute.xlu1 %818 }
 0x23c   : > { %v1800_v25 = vcombine.low %v4962_v9, %v4969_v32  ;;  %v2693_v32 = vcombine.low %v1791_v58, %v1799_v12 }
 0x23e   : > { %v869_v59 = vpop.permute.xlu0 %868  ;;  %v1807_v54 = vrot.slane %v1800_v25, %v4412_v40 }
 0x23f   : > { %v871_v22 = vpop.permute.xlu1 %870 }
 0x242   : > { %v885_v24 = vpop.permute.xlu0 %884 }
 0x243   : > { %v887_v6 = vpop.permute.xlu1 %886 }
 0x246   : > { %v4982_v29 = vpop.permute.xlu0 %912 }
 0x247   : > { %v4994_v50 = vpop.permute.xlu1 %914 }
 0x24a   : > { %v965_v41 = vpop.permute.xlu0 %964 }
 0x24b   : > { %v1840_v53 = vcombine.low %v869_v59, %v965_v41  ;;  %v967_v23 = vpop.permute.xlu1 %966  ;;  %v1664_v59 = vcombine.low %v5592_v33, %v5591_v37 }
 0x24c   : > { %v1968_v13 = vcombine.low %v871_v22, %v967_v23  ;;  %v2438_v22 = vcombine.low %v1855_v0, %v1863_v49 }
 0x24d   : > { %v1847_v28 = vrot.slane %v1840_v53, %v4412_v40  ;;  %v1671_v42 = vrot.slane %v1664_v59, %v4412_v40 }
 0x24e   : > { %v981_v10 = vpop.permute.xlu0 %980  ;;  %v1975_v8 = vrot.slane %v1968_v13, %v4412_v40  ;;  %v2701_v13 = vrot.slane %v2693_v32, %v5467_v47 }
 0x24f   : > { %v2303_v5 = vcombine.low %v1839_v43, %v1847_v28  ;;  %v1872_v39 = vcombine.low %v885_v24, %v981_v10  ;;  %v983_v62 = vpop.permute.xlu1 %982  ;;  %v1672_v24 = vcombine.low %v4957_v36, %v4967_v26  ;;  %v2676_v9 = vcombine.low %v5003_v19, %v1671_v42  ;;  %v5596_v10 = vld [vmem:[#allocation53_spill] sm:$0xff] }
 0x250   : > { %v2320_v34 = vcombine.low %v1967_v61, %v1975_v8  ;;  %v2000_v30 = vcombine.low %v887_v6, %v983_v62  ;;  %v2446_v6 = vrot.slane %v2438_v22, %v5467_v47  ;;  %v1888_v61 = vcombine.low %v5596_v10, %v5595_v45  ;;  %v5597_v8 = vld [vmem:[#allocation80_spill] sm:$0xff] }
 0x251   : > { %v2317_v56 = vrot.slane %v2303_v5, %v5467_v47  ;;  %v1879_v11 = vrot.slane %v1872_v39, %v4412_v40  ;;  %v1679_v41 = vrot.slane %v1672_v24, %v4412_v40  ;;  %v2684_v28 = vrot.slane %v2676_v9, %v5467_v47  ;;  %v5598_v39 = vld [vmem:[#allocation54_spill] sm:$0xff] }
 0x252   : > { %v1009_v63 = vpop.permute.xlu0 %1008  ;;  %v2334_v57 = vrot.slane %v2320_v34, %v5467_v47  ;;  %v2007_v46 = vrot.slane %v2000_v30, %v4412_v40  ;;  %v5602_v34 = vld [vmem:[#allocation17_spill] sm:$0xff] }
 0x253   : > { %v2439_v2 = vcombine.low %v1871_v15, %v1879_v11  ;;  %v2318_v52 = vcombine.low %v2310_v44, %v2317_v56  ;;  %v1680_v55 = vcombine.low %v4982_v29, %v1009_v63  ;;  %v1011_v21 = vpop.permute.xlu1 %1010  ;;  %v5600_v15 = vld [vmem:[#allocation16_spill] sm:$0xff]  ;;  %v5601_v56 = vld [vmem:[#allocation30_spill] sm:$0xff] }
 0x254   : > { %v2335_v0 = vcombine.low %v2327_v7, %v2334_v57  ;;  %v2456_v26 = vcombine.low %v1999_v18, %v2007_v46  ;;  %v1808_v20 = vcombine.low %v4994_v50, %v1011_v21  ;;  %v2016_v7 = vcombine.low %v5598_v39, %v5597_v8 }
 0x255   : > { %v2453_v36 = vrot.slane %v2439_v2, %v5467_v47  ;;  %v1687_v27 = vrot.slane %v1680_v55, %v4412_v40  ;;  %v1880_v62 = vcombine.low %v5600_v15, %v5599_v48  ;;  %v2008_v11 = vcombine.low %v5602_v34, %v5601_v56 }
 0x256   : > { %v709_v60 = vpop.permute.xlu0 %708  ;;  %v2470_v53 = vrot.slane %v2456_v26, %v5467_v47  ;;  %v1815_v29 = vrot.slane %v1808_v20, %v4412_v40  ;;  %v2779_v38 = vpack.c.bf16 %v2335_v0, %v2318_v52  ;;  %v1895_v18 = vrot.slane %v1888_v61, %v4412_v40 }
 0x257   : > { %v2677_v49 = vcombine.low %v1679_v41, %v1687_v27  ;;  %v711_v35 = vpop.permute.xlu1 %710  ;;  %v2454_v14 = vcombine.low %v2446_v6, %v2453_v36  ;;  %v2023_v63 = vrot.slane %v2016_v7, %v4412_v40  ;;  %v1887_v2 = vrot.slane %v1880_v62, %v4412_v40 }
 0x258   : > { %v2471_v23 = vcombine.low %v2463_v51, %v2470_v53  ;;  %v2694_v50 = vcombine.low %v1807_v54, %v1815_v29  ;;  %v2819_v43 = vunpack.c.l.b16 %v2779_v38  ;;  %v2820_v4 = vunpack.c.h.b16 %v2779_v38 }
 0x259   : > { %v2691_v19 = vrot.slane %v2677_v49, %v5467_v47  ;;  %v2015_v46 = vrot.slane %v2008_v11, %v4412_v40  ;;  %v2574_v0 = vcombine.low %v1887_v2, %v1895_v18 }
 0x25a   : > { %v805_v58 = vpop.permute.xlu0 %804  ;;  %v2708_v44 = vrot.slane %v2694_v50, %v5467_v47  ;;  %2864 = vperm.xlu0 %3337, %v2819_v43   ;;  %v2783_v37 = vpack.c.bf16 %v2471_v23, %v2454_v14  ;;  %v5603_v50 = vld [vmem:[#allocation87_spill] sm:$0xff]  ;;  %v5604_v43 = vld [vmem:[#allocation61_spill] sm:$0xff] }
 0x25b   : > { %v807_v33 = vpop.permute.xlu1 %806  ;;  %v2692_v59 = vcombine.low %v2684_v28, %v2691_v19  ;;  %v1896_v42 = vcombine.low %v709_v60, %v805_v58  ;;  %v2591_v26 = vcombine.low %v2015_v46, %v2023_v63  ;;  %v2582_v29 = vrot.slane %v2574_v0, %v5467_v47  ;;  %v5605_v28 = vld [vmem:[#allocation88_spill] sm:$0xff] }
 0x25c   : > { %v2709_v3 = vcombine.low %v2701_v13, %v2708_v44  ;;  %v2827_v16 = vunpack.c.l.b16 %v2783_v37  ;;  %v2024_v25 = vcombine.low %v711_v35, %v807_v33  ;;  %v2828_v21 = vunpack.c.h.b16 %v2783_v37  ;;  %v5606_v13 = vld [vmem:[#allocation62_spill] sm:$0xff]  ;;  %v5607_v33 = vld [vmem:[#allocation35_spill] sm:$0xff] }
 0x25d   : > { %v1903_v51 = vrot.slane %v1896_v42, %v4412_v40  ;;  %v2599_v38 = vrot.slane %v2591_v26, %v5467_v47  ;;  %v1920_v19 = vcombine.low %v5604_v43, %v5603_v50  ;;  %v2048_v44 = vcombine.low %v5606_v13, %v5605_v28 }
 0x25e   : > { %v901_v5 = vpop.permute.xlu0 %900  ;;  %2909 = vperm.xlu0 %3337, %v2834_v1   ;;  %2888 = vperm.xlu1 %3338, %v2827_v16   ;;  %v2790_v22 = vpack.c.bf16 %v2709_v3, %v2692_v59  ;;  %v2031_v20 = vrot.slane %v2024_v25, %v4412_v40  ;;  %v1912_v59 = vcombine.low %v5511_v17, %v5607_v33  ;;  %v5608_v3 = vld [vmem:[#allocation36_spill] sm:$0xff] }
 0x25f   : > { %v903_v30 = vpop.permute.xlu1 %902  ;;  %v2040_v1 = vcombine.low %v5522_v31, %v5608_v3  ;;  %v1927_v61 = vrot.slane %v1920_v19, %v4412_v40  ;;  %v2055_v8 = vrot.slane %v2048_v44, %v4412_v40  ;;  %v5609_v19 = vlaneseq }
 0x260   : > { %v2841_v12 = vunpack.c.l.b16 %v2790_v22  ;;  %v2842_v54 = vunpack.c.h.b16 %v2790_v22  ;;  %v1919_v22 = vrot.slane %v1912_v59, %v4412_v40  ;;  %v5610_v59 = vld [vmem:[#allocation8_spill] sm:$0xff] }
 0x261   : > { %v2047_v48 = vrot.slane %v2040_v1, %v4412_v40 }
 0x262   : > { %v997_v24 = vpop.permute.xlu0 %996  ;;  %2867 = vperm.xlu0 %3337, %v2820_v4   ;;  %2930 = vperm.xlu1 %3338, %v2841_v12   ;;  %v2710_v34 = vcombine.low %v1919_v22, %v1927_v61 }
 0x263   : > { %v1904_v57 = vcombine.low %v901_v5, %v997_v24  ;;  %v999_v6 = vpop.permute.xlu1 %998  ;;  %v2727_v11 = vcombine.low %v2047_v48, %v2055_v8 }
 0x264   : > { %v2032_v55 = vcombine.low %v903_v30, %v999_v6  ;;  %v2718_v24 = vrot.slane %v2710_v34, %v5467_v47 }
 0x265   : > { %v1911_v52 = vrot.slane %v1904_v57, %v4412_v40  ;;  %v2735_v63 = vrot.slane %v2727_v11, %v5467_v47 }
 0x266   : > { %v725_v36 = vpop.permute.xlu0 %724  ;;  %v2039_v32 = vrot.slane %v2032_v55, %v4412_v40  ;;  %2891 = vperm.xlu1 %3338, %v2828_v21  }
 0x267   : > { %v2575_v9 = vcombine.low %v1903_v51, %v1911_v52  ;;  %v727_v41 = vpop.permute.xlu1 %726  ;;  %v3458_v52 = vmov 0.0  }
 0x268   : > { %v2592_v60 = vcombine.low %v2031_v20, %v2039_v32  ;;  %3271 = vmatprep.subr.bf16.mxu0 %v3458_v52  ;;  %3273 = vmatprep.mubr.msk.bf16.mxu0 %vm3459_vm0, %v3458_v52 }
 0x269   : > { %v2589_v27 = vrot.slane %v2575_v9, %v5467_v47 }
 0x26a   : > { %v821_v53 = vpop.permute.xlu0 %820  ;;  %v2606_v49 = vrot.slane %v2592_v60, %v5467_v47  ;;  %2933 = vperm.xlu1 %3338, %v2842_v54  }
 0x26b   : > { %v823_v35 = vpop.permute.xlu1 %822  ;;  %v2590_v14 = vcombine.low %v2582_v29, %v2589_v27  ;;  %v1928_v45 = vcombine.low %v725_v36, %v821_v53 }
 0x26c   : > { %v2607_v23 = vcombine.low %v2599_v38, %v2606_v49  ;;  %v2056_v39 = vcombine.low %v727_v41, %v823_v35 }
 0x26d   : > { %v1935_v17 = vrot.slane %v1928_v45, %v4412_v40 }
 0x26e   : > { %v917_v58 = vpop.permute.xlu0 %916  ;;  %v2787_v37 = vpack.c.bf16 %v2607_v23, %v2590_v14  ;;  %v2063_v30 = vrot.slane %v2056_v39, %v4412_v40 }
 0x26f   : > { %v919_v16 = vpop.permute.xlu1 %918 }
 0x270   : > { %v2835_v10 = vunpack.c.l.b16 %v2787_v37  ;;  %v2836_v56 = vunpack.c.h.b16 %v2787_v37 }
 0x272   : > { %v1013_v5 = vpop.permute.xlu0 %1012  ;;  %2912 = vperm.xlu0 %3337, %v2835_v10  }
 0x273   : > { %v1936_v7 = vcombine.low %v917_v58, %v1013_v5  ;;  %v1015_v15 = vpop.permute.xlu1 %1014  ;;  %v2942_v58 = vand.u32 127, %v5609_v19 }
 0x274   : > { %v2064_v62 = vcombine.low %v919_v16, %v1015_v15 }
 0x275   : > { %v1943_v31 = vrot.slane %v1936_v7, %v4412_v40  ;;  %v2947_v44 = vadd.s32 4294967288, %v2942_v58  ;;  %v2954_v37 = vadd.s32 4294967280, %v2942_v58  ;;  %v2961_v33 = vadd.s32 4294967272, %v2942_v58 }
 0x276   : > { %v2071_v4 = vrot.slane %v2064_v62, %v4412_v40  ;;  %2915 = vperm.xlu0 %3337, %v2836_v56   ;;  %v191_v40 = vld [vmem:[%s5275_s2] sm:$0xff]  ;;  %v2945_v3 = vsub.s32 %v2942_v58, %v5610_v59  ;;  %v2968_v1 = vadd.s32 4294967264, %v2942_v58  ;;  %v2975_v10 = vadd.s32 4294967256, %v2942_v58 }
 0x277   : > { %v2711_v42 = vcombine.low %v1935_v17, %v1943_v31  ;;  %v2950_v16 = vsub.s32 %v2947_v44, %v5610_v59  ;;  %v5136_v45 = vsub.s32 %v2954_v37, %v5610_v59  ;;  %v5141_v8 = vsub.s32 %v2961_v33, %v5610_v59 }
 0x278   : > { %v2728_v18 = vcombine.low %v2063_v30, %v2071_v4  ;;  %v5146_v22 = vsub.s32 %v2968_v1, %v5610_v59  ;;  %v2982_v48 = vadd.s32 4294967248, %v2942_v58  ;;  %v5151_v31 = vsub.s32 %v2975_v10, %v5610_v59 }
 0x279   : > { %v2725_v12 = vrot.slane %v2711_v42, %v5467_v47  ;;  %v2989_v62 = vadd.s32 4294967240, %v2942_v58 }
 0x27a   : > { %v2742_v25 = vrot.slane %v2728_v18, %v5467_v47 }
 0x27b   : > { %v2726_v57 = vcombine.low %v2718_v24, %v2725_v12 }
 0x27c   : > { %v2743_v2 = vcombine.low %v2735_v63, %v2742_v25 }
 0x27e   : > { %v2791_v46 = vpack.c.bf16 %v2743_v2, %v2726_v57  ;;  %v2985_v2 = vsub.s32 %v2982_v48, %v5610_v59 }
 0x280   : > { %v2844_v6 = vunpack.c.h.b16 %v2791_v46  ;;  %v2843_v51 = vunpack.c.l.b16 %v2791_v46 }
 0x282   : > { %2939 = vperm.xlu0 %3337, %v2844_v6   ;;  %2936 = vperm.xlu1 %3338, %v2843_v51   ;;  %v2992_v51 = vsub.s32 %v2989_v62, %v5610_v59 }
 0x283   : > { %v5092_v55 = vpop.permute.xlu1 %2849  ;;  %v5094_v21 = vpop.permute.xlu0 %2846 }
 0x284   : > { %v2951_v15 = vrot.slane %v5092_v55, %v2950_v16  ;;  %v2946_v4 = vrot.slane %v5094_v21, %v2945_v3 }
 0x286   : > { %2794 = vperm.xlu1 %3338, %v191_v40   ;;  %v2953_v46 = vsel %vm2952_vm1, %v2951_v15, %v2946_v4  ;;  %v190_v4 = vld [vmem:[%s5274_s1] sm:$0xf] }
 0x287   : > { %v2871_v47 = vpop.permute.xlu1 %2870  ;;  %v2874_v0 = vpop.permute.xlu0 %2873 }
 0x288   : > { %v2999_v5 = vrot.slane %v2871_v47, %v2945_v3  ;;  %v3003_v7 = vrot.slane %v2874_v0, %v2950_v16 }
 0x28a   : > { %v3004_v56 = vsel %vm2952_vm1, %v3003_v7, %v2999_v5 }
 0x28b   : > { %v5096_v36 = vpop.permute.xlu1 %2852  ;;  %v2877_v26 = vpop.permute.xlu0 %2876 }
 0x28c   : > { %v3008_v17 = vrot.slane %v2877_v26, %v5136_v45  ;;  %v2958_v34 = vrot.slane %v5096_v36, %v5136_v45 }
 0x28e   : > { %v3009_v6 = vsel %vm2959_vm2, %v3008_v17, %v3004_v56  ;;  %v2960_v40 = vsel %vm2959_vm2, %v2958_v34, %v2953_v46 }
 0x28f   : > { %v5098_v20 = vpop.permute.xlu1 %2894  ;;  %v5100_v9 = vpop.permute.xlu0 %2897 }
 0x290   : > { %v3038_v11 = vrot.slane %v5098_v20, %v2945_v3  ;;  %v3042_v63 = vrot.slane %v5100_v9, %v2950_v16 }
 0x292   : > { %v3043_v52 = vsel %vm2952_vm1, %v3042_v63, %v3038_v11 }
 0x293   : > { %v5102_v32 = vpop.permute.xlu1 %2855  ;;  %v2880_v41 = vpop.permute.xlu0 %2879 }
 0x294   : > { %v3013_v30 = vrot.slane %v2880_v41, %v5141_v8  ;;  %v2965_v12 = vrot.slane %v5102_v32, %v5141_v8 }
 0x296   : > { %v3014_v55 = vsel %vm2966_vm3, %v3013_v30, %v3009_v6  ;;  %v2967_v47 = vsel %vm2966_vm3, %v2965_v12, %v2960_v40 }
 0x297   : > { %v5104_v27 = vpop.permute.xlu1 %2900  ;;  %v5106_v60 = vpop.permute.xlu0 %2918 }
 0x298   : > { %v3047_v18 = vrot.slane %v5104_v27, %v5136_v45  ;;  %v3077_v21 = vrot.slane %v5106_v60, %v2945_v3 }
 0x29a   : > { %v3048_v0 = vsel %vm2959_vm2, %v3047_v18, %v3043_v52 }
 0x29b   : > { %v5108_v54 = vpop.permute.xlu1 %2921 }
 0x29c   : > { %v3081_v25 = vrot.slane %v5108_v54, %v2950_v16 }
 0x29d   : > { %v5110_v53 = vpop.permute.xlu0 %2858 }
 0x29e   : > { %v2972_v57 = vrot.slane %v5110_v53, %v5146_v22  ;;  %v3082_v20 = vsel %vm2952_vm1, %v3081_v25, %v3077_v21 }
 0x2a0   : > { %v2974_v9 = vsel %vm2973_vm4, %v2972_v57, %v2967_v47 }
 0x2a1   : > { %v5112_v29 = vpop.permute.xlu1 %2882  ;;  %v5114_v38 = vpop.permute.xlu0 %2903 }
 0x2a2   : > { %v3052_v36 = vrot.slane %v5114_v38, %v5141_v8  ;;  %v3018_v26 = vrot.slane %v5112_v29, %v5146_v22 }
 0x2a4   : > { %v3053_v44 = vsel %vm2966_vm3, %v3052_v36, %v3048_v0 }
 0x2a5   : > { %v5116_v49 = vpop.permute.xlu1 %2924  ;;  %v5118_v35 = vpop.permute.xlu0 %2861 }
 0x2a6   : > { %v2979_v60 = vrot.slane %v5118_v35, %v5151_v31  ;;  %v3086_v54 = vrot.slane %v5116_v49, %v5136_v45  ;;  %v3019_v35 = vsel %vm2973_vm4, %v3018_v26, %v3014_v55 }
 0x2a8   : > { %v3087_v59 = vsel %vm2959_vm2, %v3086_v54, %v3082_v20 }
 0x2a9   : > { %v5120_v14 = vpop.permute.xlu1 %2885 }
 0x2aa   : > { %v3023_v32 = vrot.slane %v5120_v14, %v5151_v31 }
 0x2ad   : > { %v5126_v43 = vpop.permute.xlu1 %2927 }
 0x2ae   : > { %v3091_v19 = vrot.slane %v5126_v43, %v5141_v8 }
 0x2b0   : > { %v3092_v16 = vsel %vm2966_vm3, %v3091_v19, %v3087_v59 }
 0x2b5   : > { %v5122_v23 = vpop.permute.xlu0 %2906 }
 0x2b6   : > { %v3057_v41 = vrot.slane %v5122_v23, %v5146_v22 }
 0x2d9   : > { %v5124_v50 = vpop.permute.xlu0 %2864 }
 0x2da   : > { %v2986_v14 = vrot.slane %v5124_v50, %v2985_v2  ;;  %v2981_v50 = vsel %vm2980_vm5, %v2979_v60, %v2974_v9 }
 0x2dc   : > { %v2988_v45 = vsel %vm2987_vm6, %v2986_v14, %v2981_v50 }
 0x2dd   : > { %v5129_v28 = vpop.permute.xlu1 %2888  ;;  %v5131_v13 = vpop.permute.xlu0 %2909 }
 0x2de   : > { %v3062_v53 = vrot.slane %v5131_v13, %v5151_v31  ;;  %v3028_v29 = vrot.slane %v5129_v28, %v2985_v2  ;;  %v3024_v13 = vsel %vm2980_vm5, %v3023_v32, %v3019_v35  ;;  %v3058_v28 = vsel %vm2973_vm4, %v3057_v41, %v3053_v44 }
 0x2e0   : > { %v3063_v3 = vsel %vm2980_vm5, %v3062_v53, %v3058_v28  ;;  %v3029_v1 = vsel %vm2987_vm6, %v3028_v29, %v3024_v13 }
 0x2e1   : > { %v5138_v61 = vpop.permute.xlu1 %2930  ;;  %v5143_v39 = vpop.permute.xlu0 %2867 }
 0x2e2   : > { %v3096_v49 = vrot.slane %v5138_v61, %v5146_v22  ;;  %v2993_v33 = vrot.slane %v5143_v39, %v2992_v51 }
 0x2e4   : > { %v3097_v39 = vsel %vm2973_vm4, %v3096_v49, %v3092_v16  ;;  %v2995_v15 = vsel %vm2994_vm7, %v2993_v33, %v2988_v45 }
 0x2e5   : > { %v2892_v24 = vpop.permute.xlu1 %2891 }
 0x2e6   : > { %v3033_v58 = vrot.slane %v2892_v24, %v2992_v51 }
 0x2e8   : > { %v3034_v10 = vsel %vm2994_vm7, %v3033_v58, %v3029_v1 }
 0x2e9   : > { %v2934_v38 = vpop.permute.xlu1 %2933  ;;  %v3114_v62 = vsel %vm3113_vm8, %v3034_v10, %v2995_v15 }
 0x2ea   : > { %v3101_v43 = vrot.slane %v2934_v38, %v5151_v31 }
 0x2ec   : > { %v3102_v17 = vsel %vm2980_vm5, %v3101_v43, %v3097_v39 }
 0x2f1   : > { %v2913_v42 = vpop.permute.xlu0 %2912 }
 0x2f2   : > { %v3067_v23 = vrot.slane %v2913_v42, %v2985_v2 }
 0x2f4   : > { %v3068_v61 = vsel %vm2987_vm6, %v3067_v23, %v3063_v3 }
 0x2f5   : > { %v2916_v27 = vpop.permute.xlu0 %2915 }
 0x2f6   : > { %v3072_v37 = vrot.slane %v2916_v27, %v2992_v51 }
 0x2f8   : > { %v3073_v7 = vsel %vm2994_vm7, %v3072_v37, %v3068_v61 }
 0x2f9   : > { %v3116_v34 = vsel %vm3115_vm9, %v3073_v7, %v3114_v62 }
 0x301   : > { %v2940_v5 = vpop.permute.xlu0 %2939  ;;  %v2937_v8 = vpop.permute.xlu1 %2936 }
 0x302   : > { %v3111_v22 = vrot.slane %v2940_v5, %v2992_v51  ;;  %v3106_v48 = vrot.slane %v2937_v8, %v2985_v2 }
 0x304   : > { %v3107_v31 = vsel %vm2987_vm6, %v3106_v48, %v3102_v17 }
 0x305   : > { %v3112_v56 = vsel %vm2994_vm7, %v3111_v22, %v3107_v31  ;;  %v2795_v12 = vpop.permute.xlu1 %2794 }
 0x306   : > { %v3118_v11 = vsel %vm3117_vm10, %v3112_v56, %v3116_v34 }
 0x307   : > { %v3119_v30 = vpack.c.b16 %v3118_v11, %v3118_v11 }
 0x309   : > { %v3126_v42 = vsel %vm3124_vm11, %v3119_v30, 0 }
 0x30a   : > { %3272 = vmatpush3.bf16.msra.mxu0 %v3126_v42 }
 0x30d   : > { %3274 = vmatmul.mubr.msk.bf16.vlgmr.msra.gmra.mrb[0].mxu0 %vm3120_vm12, %v190_v4 }
 0x3e0   : > { %v3162_v18 = vpop.f32.mrb[0].mxu0 }
 0x3e1   : > { %v3163_v24 = vadd.f32 %v3162_v18, %v2795_v12  ;;  %v3275_v63 = vpop.f32.mrb[1].mxu0 }
 0x3e2   : > { %v3165_v25 = vpop.f32.mrb[2].mxu0 }
 0x3e3   : > { %v3276_v57 = vpop.f32.mrb[3].mxu0  ;;  %3169 = vst.msk [vmem:[%s188_s30] sm:$0xff] %vm3168_vm13, %v3163_v24 }
 0x3e4   : > { %3390 = shalt.err (!%p3387_p2)
}
 0x3e5   : > { %s3391_s5 = scalar_lea.hbm %s5229_s23, 128  ;;  %s3395_s20 = scalar_lea.hbm %s5276_s3, 256 }
 0x3e6   : > { %p3392_p4 = scmp.ne.s32.totalorder %s5229_s23, %s3391_s5  ;;  %p3396_p9 = scmp.lt.u32.totalorder %s5229_s23, %s5276_s3 }
 0x3e7   : > { %p3397_p1 = scmp.lt.u32.totalorder %s3395_s20, %s3391_s5  ;;  %p3399_p6 = scmp.lt.u32.totalorder %s3391_s5, %s5229_s23 }
 0x3e8   : > { %p3393_p5 = pnand %p3392_p4, %p5611_p11 }
 0x3e9   : > { %p3398_p3 = por %p3397_p1, %p3396_p9 }
 0x3ea   : > { %p3394_p7 = pneg %p3393_p5 }
 0x3eb   : > { %p3400_p12 = por %p3399_p6, %p3398_p3 }
 0x3ed   : > { %p3401_p13 = pnand %p3400_p12, %p3394_p7 }
 0x3ef   : > { %3404 = shalt.err (!%p3401_p13)
}
 0x3f0   : > { %3279 = dma.vmem_to_hbm [thread:$0]  (%p5611_p11), %s5231_s9, 128, %s5229_s23, %s3171_s16  }
 0x3f1 PF: > { %s3196_s27 = sand.u32 1, %s3431_s12   ;;  %p5612_p8 = scmp.ne.s32.totalorder %s5315_s25, 0 }
 0x3f2   : > { %p5613_p10 = scmp.ge.s32.totalorder %s3443_s15, 2  ;;  %s3197_s28 = scalar_lea.sflag [#allocation4], %s3196_s27 }
 0x3f4   : > { %p3286_p0 = pnand %p5613_p10, %p5612_p8 }
 0x3f6   : > { %3426 = dma.done.wait (!%p3286_p0), %s3197_s28, 128  }
 0x3f7   : > { %3428 = vsyncadd (!%p3286_p0), %s3197_s28, 4294967168  ;;  %p16_p2 = scmp.ge.s32.totalorder %s3506_s18, 4   ;;  %s5614_s12 = smov %s3435_s13 }
 0x3f8   : > { %s5615_s13 = smov %s3439_s14  ;;  %s5616_s14 = smov %s3518_s21 }
 0x3f9   : > { %s5617_s15 = smov %s3506_s18  ;;  %18 = sbr.rel (!%p16_p2) target bundleno = 5 (0x5), region = 77 }
 0x400   :  { %3202 = vsyncpa [#allocation3], 1 }
 0x401   :  { %3204 = vsyncpa [#allocation3 + $0x1], 1 }
 0x402   :  { %3205 = vsyncpa [#allocation4], 1 }
 0x403   :  { %3207 = vsyncpa [#allocation4 + $0x1], 1 }

// kernel: tpu_custom_call.1
= control target key start
LH: loop header
LB: loop body
LE: loop exit
PB: predicated region body
PF: predicated region fallthrough
CT: control target
= control target key end

     0   :  { %8 = vsyncpa [#allocation3], 0  ;;  %s636_s0 = inlined_call_operand.vmem [shape: bf16[2,4,64], index: 0, kind: input, shape index: {}]   ;;  %s637_s1 = inlined_call_operand.vmem [shape: bf16[8,4], index: 1, kind: input, shape index: {}]   ;;  %s638_s2 = inlined_call_operand.vmem [shape: f32[8,1], index: 2, kind: input, shape index: {}]   ;;  %s639_s3 = inlined_call_operand.hbm [shape: f32[2,8,64], index: 3, kind: output, shape index: {}]  }
   0x1   :  { %10 = vsyncpa [#allocation3 + $0x1], 0  ;;  %s518_s12 = smov 0   ;;  %s520_s13 = smov 0  }
   0x2   :  { %s522_s14 = smov 0   ;;  %s524_s15 = smov 0  }
   0x3   :  { %s526_s16 = smov 0   ;;  %s528_s17 = smov 0  }
   0x4 LB: > { %s335_s18 = sadd.s32 4294967295, %s492_s17   ;;  %s336_s19 = sadd.s32 4294967294, %s492_s17   ;;  %s492_s17 = sphi %s528_s17, %s16_s17   ;;  %s488_s16 = sphi %s526_s16, %s646_s16   ;;  %s484_s15 = sphi %s524_s15, %s645_s15   ;;  %s480_s14 = sphi %s522_s14, %s644_s14   ;;  %s476_s13 = sphi %s520_s13, %s643_s13   ;;  %s472_s12 = sphi %s518_s12, %s642_s12  }
   0x5   : > { %s28_s20 = sadd.s32 1, %s488_s16  ;;  %s107_s21 = sadd.s32 1, %s480_s14 }
   0x6   : > { %p30_p0 = scmp.ge.s32.totalorder %s28_s20, 2  ;;  %p117_p1 = scmp.ne.s32.totalorder %s480_s14, %s476_s13 }
   0x7   : > { %p118_p2 = scmp.eq.s32.totalorder %s335_s18, 1  ;;  %p123_p3 = scmp.ne.s32.totalorder %s476_s13, %s472_s12 }
   0x8   : > { %s648_s20 = smov (%p30_p0, %s28_s20), 0  ;;  %p124_p5 = scmp.eq.s32.totalorder %s336_s19, 1 }
   0x9   : > { %p558_p4 = por %p118_p2, %p117_p1  ;;  %s102_s23 = ssub.s32 %s488_s16, %s648_s20 }
   0xa   : > { %p339_p6 = scmp.ge.s32.totalorder %s492_s17, 1  ;;  %p105_p7 = scmp.eq.s32.totalorder %s102_s23, 0 }
   0xb   : > { %p565_p8 = por %p124_p5, %p123_p3  ;;  %p158_p9 = scmp.lt.s32.totalorder %s492_s17, 3 }
   0xc   : > { %s571_s25 = scalar_select %p105_p7, %s480_s14, %s107_s21  }
   0xd   : > { %p159_p10 = pnand %p339_p6, %p158_p9 }
   0xe   : > { %p184_p11 = scmp.lt.s32.totalorder (!%p159_p10), %s484_s15, 1  ;;  %v494_v0 = vmov (!%p159_p10), 0.0   ;;  %vm495_vm0 = vmmov (!%p159_p10), 0   ;;  %v194_v1 = vld [vmem:[%s638_s2] sm:$0xff] (!%p159_p10)  ;;  %v496_v2 = vmov (!%p159_p10), 0   ;;  %vm204_vm1 = vcmask (!%p159_p10), 1041408  }
   0xf   : > { %162 = sbr.rel (%p159_p10) target bundleno = 259 (0x103), region = 32  ;;  %349 = vmatprep.subr.bf16.mxu0 (!%p159_p10), %v494_v0  ;;  %351 = vmatprep.mubr.msk.bf16.mxu0 (!%p159_p10), %vm495_vm0, %v494_v0  ;;  %v192_v5 = vld [vmem:[%s637_s1] sm:$0xf] (!%p159_p10)  ;;  %vm200_vm2 = vcmask (!%p159_p10), 31744   ;;  %s181_s8 = sand.u32 (!%p159_p10), 1, %s476_s13  }
  0x10   : > { %413 = vset.pattern.permute.xlu0 (!%p159_p10), %v496_v2  ;;  %s340_s9 = sshll.u32 (!%p159_p10), %s181_s8, 3  ;;  %s344_s10 = sshll.u32 (!%p159_p10), %s484_s15, 7 }
  0x11   : > { %197 = vperm.xlu0 (!%p159_p10), %413, %v194_v1   ;;  %s183_s11 = scalar_lea.vmem (!%p159_p10), [#allocation2], %s340_s9  ;;  %s589_s23 = scalar_lea.hbm (!%p159_p10), %s639_s3, %s344_s10 }
  0x12   : > { %s264_s18 = sshll.u32 (!%p159_p10), %s183_s11, 4  ;;  %s250_s26 = scalar_lea.sflag (!%p159_p10), [#allocation3], %s181_s8  ;;  %s591_s18 = int_to_ptr.vmem [resolvable:$true] %s264_s18 }
  0x13   : > { %s497_s27 = smov (!%p159_p10), [#allocation2]  }
  0x16   : > { %s185_s28 = scalar_select %p184_p11, %s484_s15, 1 }
  0x17   : > { %s414_s15 = scalar_lea.vmem %s591_s18, 128 }
  0x18   : > { %s341_s29 = sshll.u32 %s185_s28, 1  ;;  %p415_p12 = scmp.ne.s32.totalorder %s591_s18, %s414_s15 }
  0x19   : > { %s190_s5 = scalar_lea.vmem %s636_s0, %s341_s29  ;;  %s418_s28 = sshll.u32 %s497_s27, 4  ;;  %s419_s28 = int_to_ptr.vmem [resolvable:$false] %s418_s28 }
  0x1a   : > { %v193_v3 = vld [vmem:[%s190_s5] sm:$0x3]  ;;  %p416_p13 = pnand %p415_p12, %p558_p4  ;;  %s420_s29 = scalar_lea.vmem %s419_s28, 256 }
  0x1b   : > { %v206_v4 = vsel %vm204_vm1, %v193_v3, 0  ;;  %p421_p1 = scmp.lt.s32.totalorder %s591_s18, %s419_s28  ;;  %p422_p2 = scmp.lt.s32.totalorder %s420_s29, %s414_s15 }
  0x1c   : > { %350 = vmatpush3.bf16.msra.mxu0 %v206_v4  ;;  %p417_p0 = pneg %p416_p13 }
  0x1d   : > { %p423_p3 = por %p422_p2, %p421_p1 }
  0x1f   : > { %352 = vmatmul.mubr.msk.bf16.vlgmr.msra.gmra.mrb[0].mxu0 %vm200_vm2, %v192_v5  ;;  %p424_p5 = pnand %p423_p3, %p417_p0 }
  0x90   : > { %v198_v6 = vpop.permute.xlu0 %197 }
  0xf2   : > { %v242_v7 = vpop.f32.mrb[0].mxu0 }
  0xf3   : > { %v243_v8 = vadd.f32 %v242_v7, %v198_v6  ;;  %v353_v9 = vpop.f32.mrb[1].mxu0 }
  0xf4   : > { %v245_v10 = vpop.f32.mrb[2].mxu0 }
  0xf5   : > { %248 = vst [vmem:[%s183_s11] sm:$0xff] %v243_v8  ;;  %v354_v11 = vpop.f32.mrb[3].mxu0 }
  0xf6   : > { %427 = shalt.err (!%p424_p5)
}
  0xf7   : > { %s428_s30 = scalar_lea.hbm %s589_s23, 128  ;;  %s432_s6 = scalar_lea.hbm %s639_s3, 256 }
  0xf8   : > { %p429_p6 = scmp.ne.s32.totalorder %s589_s23, %s428_s30  ;;  %p433_p10 = scmp.lt.u32.totalorder %s589_s23, %s639_s3 }
  0xf9   : > { %p434_p11 = scmp.lt.u32.totalorder %s432_s6, %s428_s30  ;;  %p436_p13 = scmp.lt.u32.totalorder %s428_s30, %s589_s23 }
  0xfa   : > { %p430_p7 = pnand %p429_p6, %p558_p4 }
  0xfb   : > { %p435_p12 = por %p434_p11, %p433_p10 }
  0xfc   : > { %p431_p9 = pneg %p430_p7 }
  0xfd   : > { %p437_p0 = por %p436_p13, %p435_p12 }
  0xff   : > { %p438_p1 = pnand %p437_p0, %p431_p9 }
 0x101   : > { %441 = shalt.err (!%p438_p1)
}
 0x102   : > { %355 = dma.vmem_to_hbm [thread:$0]  (%p558_p4), %s591_s18, 128, %s589_s23, %s250_s26  }
 0x103 PF: > { %p361_p2 = scmp.ge.s32.totalorder %s492_s17, 2  ;;  %s276_s9 = sand.u32 1, %s472_s12  }
 0x104   : > { %s277_s10 = scalar_lea.sflag [#allocation3], %s276_s9 }
 0x105   : > { %p358_p3 = pnand %p361_p2, %p565_p8 }
 0x107   : > { %467 = dma.done.wait (!%p358_p3), %s277_s10, 128  }
 0x108   : > { %469 = vsyncadd (!%p358_p3), %s277_s10, 4294967168  ;;  %s16_s17 = sadd.s32 1, %s492_s17   ;;  %s642_s12 = smov %s476_s13 }
 0x109   : > { %p13_p5 = scmp.ge.s32.totalorder %s16_s17, 4   ;;  %s643_s13 = smov %s480_s14 }
 0x10a   : > { %s644_s14 = smov %s571_s25  ;;  %s645_s15 = smov %s488_s16 }
 0x10b   : > { %s646_s16 = smov %s648_s20  ;;  %15 = sbr.rel (!%p13_p5) target bundleno = 4 (0x4), region = 67 }
 0x112   :  { %282 = vsyncpa [#allocation3], 1 }
 0x113   :  { %284 = vsyncpa [#allocation3 + $0x1], 1 }

// kernel: tpu_custom_call.1
= control target key start
LH: loop header
LB: loop body
LE: loop exit
PB: predicated region body
PF: predicated region fallthrough
CT: control target
= control target key end

     0   :  { %8 = vsyncpa [#allocation3], 0  ;;  %s636_s0 = inlined_call_operand.vmem [shape: bf16[2,4,64], index: 0, kind: input, shape index: {}]   ;;  %s637_s1 = inlined_call_operand.vmem [shape: bf16[8,4], index: 1, kind: input, shape index: {}]   ;;  %s638_s2 = inlined_call_operand.vmem [shape: f32[8,1], index: 2, kind: input, shape index: {}]   ;;  %s639_s3 = inlined_call_operand.hbm [shape: f32[2,8,64], index: 3, kind: output, shape index: {}]  }
   0x1   :  { %10 = vsyncpa [#allocation3 + $0x1], 0  ;;  %s518_s12 = smov 0   ;;  %s520_s13 = smov 0  }
   0x2   :  { %s522_s14 = smov 0   ;;  %s524_s15 = smov 0  }
   0x3   :  { %s526_s16 = smov 0   ;;  %s528_s17 = smov 0  }
   0x4 LB: > { %s335_s18 = sadd.s32 4294967295, %s492_s17   ;;  %s336_s19 = sadd.s32 4294967294, %s492_s17   ;;  %s492_s17 = sphi %s528_s17, %s16_s17   ;;  %s488_s16 = sphi %s526_s16, %s646_s16   ;;  %s484_s15 = sphi %s524_s15, %s645_s15   ;;  %s480_s14 = sphi %s522_s14, %s644_s14   ;;  %s476_s13 = sphi %s520_s13, %s643_s13   ;;  %s472_s12 = sphi %s518_s12, %s642_s12  }
   0x5   : > { %s28_s20 = sadd.s32 1, %s488_s16  ;;  %s107_s21 = sadd.s32 1, %s480_s14 }
   0x6   : > { %p30_p0 = scmp.ge.s32.totalorder %s28_s20, 2  ;;  %p117_p1 = scmp.ne.s32.totalorder %s480_s14, %s476_s13 }
   0x7   : > { %p118_p2 = scmp.eq.s32.totalorder %s335_s18, 1  ;;  %p123_p3 = scmp.ne.s32.totalorder %s476_s13, %s472_s12 }
   0x8   : > { %s648_s20 = smov (%p30_p0, %s28_s20), 0  ;;  %p124_p5 = scmp.eq.s32.totalorder %s336_s19, 1 }
   0x9   : > { %p558_p4 = por %p118_p2, %p117_p1  ;;  %s102_s23 = ssub.s32 %s488_s16, %s648_s20 }
   0xa   : > { %p339_p6 = scmp.ge.s32.totalorder %s492_s17, 1  ;;  %p105_p7 = scmp.eq.s32.totalorder %s102_s23, 0 }
   0xb   : > { %p565_p8 = por %p124_p5, %p123_p3  ;;  %p158_p9 = scmp.lt.s32.totalorder %s492_s17, 3 }
   0xc   : > { %s571_s25 = scalar_select %p105_p7, %s480_s14, %s107_s21  }
   0xd   : > { %p159_p10 = pnand %p339_p6, %p158_p9 }
   0xe   : > { %p184_p11 = scmp.lt.s32.totalorder (!%p159_p10), %s484_s15, 1  ;;  %v494_v0 = vmov (!%p159_p10), 0.0   ;;  %vm495_vm0 = vmmov (!%p159_p10), 0   ;;  %v194_v1 = vld [vmem:[%s638_s2] sm:$0xff] (!%p159_p10)  ;;  %v496_v2 = vmov (!%p159_p10), 0   ;;  %vm204_vm1 = vcmask (!%p159_p10), 1041408  }
   0xf   : > { %162 = sbr.rel (%p159_p10) target bundleno = 259 (0x103), region = 32  ;;  %349 = vmatprep.subr.bf16.mxu0 (!%p159_p10), %v494_v0  ;;  %351 = vmatprep.mubr.msk.bf16.mxu0 (!%p159_p10), %vm495_vm0, %v494_v0  ;;  %v192_v5 = vld [vmem:[%s637_s1] sm:$0xf] (!%p159_p10)  ;;  %vm200_vm2 = vcmask (!%p159_p10), 31744   ;;  %s181_s8 = sand.u32 (!%p159_p10), 1, %s476_s13  }
  0x10   : > { %413 = vset.pattern.permute.xlu0 (!%p159_p10), %v496_v2  ;;  %s340_s9 = sshll.u32 (!%p159_p10), %s181_s8, 3  ;;  %s344_s10 = sshll.u32 (!%p159_p10), %s484_s15, 7 }
  0x11   : > { %197 = vperm.xlu0 (!%p159_p10), %413, %v194_v1   ;;  %s183_s11 = scalar_lea.vmem (!%p159_p10), [#allocation2], %s340_s9  ;;  %s589_s23 = scalar_lea.hbm (!%p159_p10), %s639_s3, %s344_s10 }
  0x12   : > { %s264_s18 = sshll.u32 (!%p159_p10), %s183_s11, 4  ;;  %s250_s26 = scalar_lea.sflag (!%p159_p10), [#allocation3], %s181_s8  ;;  %s591_s18 = int_to_ptr.vmem [resolvable:$true] %s264_s18 }
  0x13   : > { %s497_s27 = smov (!%p159_p10), [#allocation2]  }
  0x16   : > { %s185_s28 = scalar_select %p184_p11, %s484_s15, 1 }
  0x17   : > { %s414_s15 = scalar_lea.vmem %s591_s18, 128 }
  0x18   : > { %s341_s29 = sshll.u32 %s185_s28, 1  ;;  %p415_p12 = scmp.ne.s32.totalorder %s591_s18, %s414_s15 }
  0x19   : > { %s190_s5 = scalar_lea.vmem %s636_s0, %s341_s29  ;;  %s418_s28 = sshll.u32 %s497_s27, 4  ;;  %s419_s28 = int_to_ptr.vmem [resolvable:$false] %s418_s28 }
  0x1a   : > { %v193_v3 = vld [vmem:[%s190_s5] sm:$0x3]  ;;  %p416_p13 = pnand %p415_p12, %p558_p4  ;;  %s420_s29 = scalar_lea.vmem %s419_s28, 256 }
  0x1b   : > { %v206_v4 = vsel %vm204_vm1, %v193_v3, 0  ;;  %p421_p1 = scmp.lt.s32.totalorder %s591_s18, %s419_s28  ;;  %p422_p2 = scmp.lt.s32.totalorder %s420_s29, %s414_s15 }
  0x1c   : > { %350 = vmatpush3.bf16.msra.mxu0 %v206_v4  ;;  %p417_p0 = pneg %p416_p13 }
  0x1d   : > { %p423_p3 = por %p422_p2, %p421_p1 }
  0x1f   : > { %352 = vmatmul.mubr.msk.bf16.vlgmr.msra.gmra.mrb[0].mxu0 %vm200_vm2, %v192_v5  ;;  %p424_p5 = pnand %p423_p3, %p417_p0 }
  0x90   : > { %v198_v6 = vpop.permute.xlu0 %197 }
  0xf2   : > { %v242_v7 = vpop.f32.mrb[0].mxu0 }
  0xf3   : > { %v243_v8 = vadd.f32 %v242_v7, %v198_v6  ;;  %v353_v9 = vpop.f32.mrb[1].mxu0 }
  0xf4   : > { %v245_v10 = vpop.f32.mrb[2].mxu0 }
  0xf5   : > { %248 = vst [vmem:[%s183_s11] sm:$0xff] %v243_v8  ;;  %v354_v11 = vpop.f32.mrb[3].mxu0 }
  0xf6   : > { %427 = shalt.err (!%p424_p5)
}
  0xf7   : > { %s428_s30 = scalar_lea.hbm %s589_s23, 128  ;;  %s432_s6 = scalar_lea.hbm %s639_s3, 256 }
  0xf8   : > { %p429_p6 = scmp.ne.s32.totalorder %s589_s23, %s428_s30  ;;  %p433_p10 = scmp.lt.u32.totalorder %s589_s23, %s639_s3 }
  0xf9   : > { %p434_p11 = scmp.lt.u32.totalorder %s432_s6, %s428_s30  ;;  %p436_p13 = scmp.lt.u32.totalorder %s428_s30, %s589_s23 }
  0xfa   : > { %p430_p7 = pnand %p429_p6, %p558_p4 }
  0xfb   : > { %p435_p12 = por %p434_p11, %p433_p10 }
  0xfc   : > { %p431_p9 = pneg %p430_p7 }
  0xfd   : > { %p437_p0 = por %p436_p13, %p435_p12 }
  0xff   : > { %p438_p1 = pnand %p437_p0, %p431_p9 }
 0x101   : > { %441 = shalt.err (!%p438_p1)
}
 0x102   : > { %355 = dma.vmem_to_hbm [thread:$0]  (%p558_p4), %s591_s18, 128, %s589_s23, %s250_s26  }
 0x103 PF: > { %p361_p2 = scmp.ge.s32.totalorder %s492_s17, 2  ;;  %s276_s9 = sand.u32 1, %s472_s12  }
 0x104   : > { %s277_s10 = scalar_lea.sflag [#allocation3], %s276_s9 }
 0x105   : > { %p358_p3 = pnand %p361_p2, %p565_p8 }
 0x107   : > { %467 = dma.done.wait (!%p358_p3), %s277_s10, 128  }
 0x108   : > { %469 = vsyncadd (!%p358_p3), %s277_s10, 4294967168  ;;  %s16_s17 = sadd.s32 1, %s492_s17   ;;  %s642_s12 = smov %s476_s13 }
 0x109   : > { %p13_p5 = scmp.ge.s32.totalorder %s16_s17, 4   ;;  %s643_s13 = smov %s480_s14 }
 0x10a   : > { %s644_s14 = smov %s571_s25  ;;  %s645_s15 = smov %s488_s16 }
 0x10b   : > { %s646_s16 = smov %s648_s20  ;;  %15 = sbr.rel (!%p13_p5) target bundleno = 4 (0x4), region = 67 }
 0x112   :  { %282 = vsyncpa [#allocation3], 1 }
 0x113   :  { %284 = vsyncpa [#allocation3 + $0x1], 1 }

</bundles_post_ra>
